<compile_context>
chip_gen: v7x
topology: tpu7x:2x2x1
jax: 0.10.0
libtpu: 0.0.40
codegen_flags: <defaults>
</compile_context>

<pallas_src>
import functools

import numpy as np
import jax
import jax.numpy as jnp
from jax import lax
from jax.experimental import pallas as pl
from jax.experimental.pallas import tpu as pltpu

_EPS = 1e-5


# ----------------------------------------------------------------------------
# Pallas kernels
# ----------------------------------------------------------------------------
def _conv1x1_bn_relu_kernel(x_ref, w_ref, scale_ref, shift_ref, o_ref):
    # x: (TM, Cin) f32 | w: (Cin, C1) bf16 | scale/shift: (1, C1) f32
    x = x_ref[...].astype(jnp.bfloat16)
    y = jnp.dot(x, w_ref[...], preferred_element_type=jnp.float32)
    y = y * scale_ref[...] + shift_ref[...]          # BN (conv bias folded in)
    o_ref[...] = jnp.maximum(y, 0.0).astype(o_ref.dtype)


def _grouped_conv3x3_relu_kernel(x_ref, w_ref, b_ref, o_ref, xp_sc, acc_sc,
                                 *, H, W, Ho, Wo, stride):
    # x: (1, H, W, C) bf16 (one image) | w: (9, C, C) bf16 block-diag per tap
    # b: (1, C) f32 | xp_sc: (1, H+2, W+2, C) bf16 | acc_sc: (Ho*Wo, C) f32
    C = x_ref.shape[-1]

    # Zero-pad into VMEM scratch (no HBM pad pass).
    xp_sc[...] = jnp.zeros_like(xp_sc)
    xp_sc[:, 1:H + 1, 1:W + 1, :] = x_ref[...]
    acc_sc[...] = jnp.zeros_like(acc_sc)

    hspan = (Ho - 1) * stride + 1
    wspan = (Wo - 1) * stride + 1
    for kh in range(3):
        for kw in range(3):
            patch = xp_sc[0, kh:kh + hspan, kw:kw + wspan, :]
            if stride > 1:
                patch = patch[::stride, ::stride, :]
            acc_sc[...] += jnp.dot(patch.reshape(Ho * Wo, C),
                                   w_ref[kh * 3 + kw],
                                   preferred_element_type=jnp.float32)

    out = jnp.maximum(acc_sc[...] + b_ref[...], 0.0)
    o_ref[0] = out.astype(o_ref.dtype)


def _conv1x1_convshortcut_relu_kernel(h_ref, xs_ref, w3_ref, b3_ref,
                                      ws_ref, bs_ref, o_ref):
    # h: (TM, C1) bf16 | xs: (TM, Cin) f32 | w3: (C1, C3) bf16 | ws: (Cin, C3) bf16
    y = jnp.dot(h_ref[...], w3_ref[...], preferred_element_type=jnp.float32)
    y = y + b3_ref[...]
    s = jnp.dot(xs_ref[...].astype(jnp.bfloat16), ws_ref[...],
                preferred_element_type=jnp.float32)
    s = s + bs_ref[...]
    o_ref[...] = jnp.maximum(y + s, 0.0).astype(o_ref.dtype)


def _conv1x1_identity_relu_kernel(h_ref, xs_ref, w3_ref, b3_ref, o_ref):
    y = jnp.dot(h_ref[...], w3_ref[...], preferred_element_type=jnp.float32)
    y = y + b3_ref[...] + xs_ref[...].astype(jnp.float32)
    o_ref[...] = jnp.maximum(y, 0.0).astype(o_ref.dtype)


# ----------------------------------------------------------------------------
# BlockSpec helpers
# ----------------------------------------------------------------------------
def _row_spec(tm, cols):
    return pl.BlockSpec((tm, cols), lambda i: (i, 0))


def _resident_spec(shape):
    nd = len(shape)
    return pl.BlockSpec(shape, lambda i, _nd=nd: (0,) * _nd)


def _pick_row_tile(p):
    # Largest tile (multiple of 8 sublanes) that evenly divides the row count.
    for t in (1024, 512, 256, 128, 64, 32, 16, 8):
        if p % t == 0:
            return t
    return p


# ----------------------------------------------------------------------------
# Parameter setup / prep
# ----------------------------------------------------------------------------
def init_params(key, in_planes, cardinality, bottleneck_width, stride=1):
    G = cardinality
    C1 = cardinality * bottleneck_width
    Cg = bottleneck_width
    C3 = 2 * C1
    ks = jax.random.split(key, 12)

    def rnd(k, shape, scale=0.1):
        return scale * jax.random.normal(k, shape, dtype=jnp.float32)

    p = dict(
        w1=rnd(ks[0], (in_planes, C1)),
        b1=rnd(ks[1], (1, C1)),
        bn_gamma=1.0 + 0.1 * jax.random.normal(ks[2], (1, C1), dtype=jnp.float32),
        bn_beta=rnd(ks[3], (1, C1)),
        bn_mean=rnd(ks[4], (1, C1)),
        bn_var=jnp.abs(0.5 + 0.1 * jax.random.normal(ks[5], (1, C1),
                                                     dtype=jnp.float32)),
        w2=rnd(ks[6], (G, 3, 3, Cg, Cg)),        # grouped 3x3 conv
        b2=rnd(ks[7], (1, C1)),
        w3=rnd(ks[8], (C1, C3)),
        b3=rnd(ks[9], (1, C3)),
    )
    if stride != 1 or in_planes != C3:           # conv shortcut (as in PyTorch)
        p["ws"] = rnd(ks[10], (in_planes, C3))
        p["bs"] = rnd(ks[11], (1, C3))
    return p


def prepare_params(params, *, cardinality, bottleneck_width, eps=_EPS):
    """One-time prep: fold BN (+conv1 bias), build bf16 block-diag 3x3 taps."""
    G = cardinality
    Cg = bottleneck_width
    C1 = G * Cg

    scale = params["bn_gamma"] / jnp.sqrt(params["bn_var"] + eps)
    shift = params["bn_beta"] - params["bn_mean"] * scale + params["b1"] * scale

    # (G, 3, 3, Cg, Cg) -> (9, C1, C1) block-diagonal per tap, in bf16.
    w2 = params["w2"]
    eye = jnp.eye(G, dtype=w2.dtype)
    w2_bd = jnp.einsum("gabio,gh->abgiho", w2, eye)          # (3,3,G,Cg,G,Cg)
    w2_taps = w2_bd.reshape(9, C1, C1).astype(jnp.bfloat16)

    prep = dict(
        w1=params["w1"].astype(jnp.bfloat16),
        scale=scale.astype(jnp.float32),
        shift=shift.astype(jnp.float32),
        w2_taps=w2_taps,
        b2=params["b2"].astype(jnp.float32),
        w3=params["w3"].astype(jnp.bfloat16),
        b3=params["b3"].astype(jnp.float32),
    )
    if "ws" in params:
        prep["ws"] = params["ws"].astype(jnp.bfloat16)
        prep["bs"] = params["bs"].astype(jnp.float32)
    return prep


# ----------------------------------------------------------------------------
# Forward pass
# ----------------------------------------------------------------------------
def block_forward(x_nchw, prep, *, cardinality, bottleneck_width, stride=1):
    x = jnp.transpose(x_nchw, (0, 2, 3, 1)).astype(jnp.float32)   # NCHW -> NHWC
    N, H, W, Cin = x.shape
    C1 = cardinality * bottleneck_width
    C3 = 2 * C1
    Ho = (H - 1) // stride + 1
    Wo = (W - 1) // stride + 1

    parallel = pltpu.CompilerParams(dimension_semantics=("parallel",))

    # --- stage 1: conv1 (1x1) + BN + ReLU, tiled over flattened rows --------
    P1 = N * H * W
    tm1 = _pick_row_tile(P1)
    x_flat = x.reshape(P1, Cin)
    h1 = pl.pallas_call(
        _conv1x1_bn_relu_kernel,
        grid=(P1 // tm1,),
        in_specs=[_row_spec(tm1, Cin),
                  _resident_spec((Cin, C1)),
                  _resident_spec((1, C1)),
                  _resident_spec((1, C1))],
        out_specs=_row_spec(tm1, C1),
        out_shape=jax.ShapeDtypeStruct((P1, C1), jnp.bfloat16),
        compiler_params=parallel,
    )(x_flat, prep["w1"], prep["scale"], prep["shift"])

    # --- stage 2: grouped 3x3 conv + ReLU, one image per grid step ----------
    # TODO(synk): for very large H*W*C1 (v7x 64 MiB VMEM) switch to row-halo
    #             tiling within the image; per-image tiles suffice here.
    h1_img = h1.reshape(N, H, W, C1)
    k2 = functools.partial(_grouped_conv3x3_relu_kernel,
                           H=H, W=W, Ho=Ho, Wo=Wo, stride=stride)
    h2 = pl.pallas_call(
        k2,
        grid=(N,),
        in_specs=[pl.BlockSpec((1, H, W, C1), lambda n: (n, 0, 0, 0)),
                  _resident_spec((9, C1, C1)),
                  _resident_spec((1, C1))],
        out_specs=pl.BlockSpec((1, Ho * Wo, C1), lambda n: (n, 0, 0)),
        out_shape=jax.ShapeDtypeStruct((N, Ho * Wo, C1), jnp.bfloat16),
        scratch_shapes=[pltpu.VMEM((1, H + 2, W + 2, C1), jnp.bfloat16),
                        pltpu.VMEM((Ho * Wo, C1), jnp.float32)],
        compiler_params=parallel,
    )(h1_img, prep["w2_taps"], prep["b2"])

    # --- stage 3: conv3 (1x1) + shortcut + add + ReLU, tiled over rows ------
    P2 = N * Ho * Wo
    tm3 = _pick_row_tile(P2)
    h2_flat = h2.reshape(P2, C1)
    if stride == 1:
        xs_flat = x_flat
    else:
        # TODO(synk): strided shortcut subsample still runs as an XLA slice;
        #             could be folded into the BlockSpec index_map.
        xs_flat = x[:, ::stride, ::stride, :].reshape(P2, Cin)

    if "ws" in prep:                       # conv shortcut
        out = pl.pallas_call(
            _conv1x1_convshortcut_relu_kernel,
            grid=(P2 // tm3,),
            in_specs=[_row_spec(tm3, C1),
                      _row_spec(tm3, Cin),
                      _resident_spec((C1, C3)),
                      _resident_spec((1, C3)),
                      _resident_spec((Cin, C3)),
                      _resident_spec((1, C3))],
            out_specs=_row_spec(tm3, C3),
            out_shape=jax.ShapeDtypeStruct((P2, C3), jnp.float32),
            compiler_params=parallel,
        )(h2_flat, xs_flat, prep["w3"], prep["b3"], prep["ws"], prep["bs"])
    else:                                  # identity shortcut (Cin == C3)
        out = pl.pallas_call(
            _conv1x1_identity_relu_kernel,
            grid=(P2 // tm3,),
            in_specs=[_row_spec(tm3, C1),
                      _row_spec(tm3, Cin),
                      _resident_spec((C1, C3)),
                      _resident_spec((1, C3))],
            out_specs=_row_spec(tm3, C3),
            out_shape=jax.ShapeDtypeStruct((P2, C3), jnp.float32),
            compiler_params=parallel,
        )(h2_flat, xs_flat, prep["w3"], prep["b3"])

    out = out.reshape(N, Ho, Wo, C3)
    return jnp.transpose(out, (0, 3, 1, 2))                        # back to NCHW


# ----------------------------------------------------------------------------
# Pure-JAX reference (for correctness check)
# ----------------------------------------------------------------------------
def reference_forward(x_nchw, p, *, cardinality, bottleneck_width, stride=1):
    x = jnp.transpose(x_nchw, (0, 2, 3, 1)).astype(jnp.float32)
    G = cardinality
    C1 = cardinality * bottleneck_width
    Cg = bottleneck_width
    C3 = 2 * C1
    Cin = x.shape[-1]
    dn = ("NHWC", "HWIO", "NHWC")

    y = lax.conv_general_dilated(x, p["w1"].reshape(1, 1, Cin, C1), (1, 1),
                                 "VALID", dimension_numbers=dn) + p["b1"]
    y = (y - p["bn_mean"]) / jnp.sqrt(p["bn_var"] + _EPS) * p["bn_gamma"] + p["bn_beta"]
    y = jnp.maximum(y, 0.0)

    w2_hwio = jnp.transpose(p["w2"], (1, 2, 3, 0, 4)).reshape(3, 3, Cg, C1)
    y = lax.conv_general_dilated(y, w2_hwio, (stride, stride),
                                 ((1, 1), (1, 1)), dimension_numbers=dn,
                                 feature_group_count=G) + p["b2"]
    y = jnp.maximum(y, 0.0)

    y = lax.conv_general_dilated(y, p["w3"].reshape(1, 1, C1, C3), (1, 1),
                                 "VALID", dimension_numbers=dn) + p["b3"]
    if "ws" in p:
        s = lax.conv_general_dilated(x, p["ws"].reshape(1, 1, Cin, C3),
                                     (stride, stride), "VALID",
                                     dimension_numbers=dn) + p["bs"]
    else:
        s = x[:, ::stride, ::stride, :]
    out = jnp.maximum(y + s, 0.0)
    return jnp.transpose(out, (0, 3, 1, 2))


# ----------------------------------------------------------------------------
if __name__ == "__main__":
    key = jax.random.PRNGKey(0)
    kx, kp = jax.random.split(key)

    # Block(in_planes=8, cardinality=4, bottleneck_width=2, stride=1):
    # group_width=8, out_channels=16 -> conv shortcut path (as in the module).
    in_planes, cardinality, bottleneck_width, stride = 8, 4, 2, 1
    N, H, W = 2, 32, 32          # P = 2048 rows -> multi-step, pipelined grid

    x_nchw = jax.random.normal(kx, (N, in_planes, H, W), dtype=jnp.float32)
    params = init_params(kp, in_planes, cardinality, bottleneck_width, stride)
    prep = prepare_params(params, cardinality=cardinality,
                          bottleneck_width=bottleneck_width)

    out = block_forward(x_nchw, prep, cardinality=cardinality,
                        bottleneck_width=bottleneck_width, stride=stride)
    out = jax.block_until_ready(out)

    ref = reference_forward(x_nchw, params, cardinality=cardinality,
                            bottleneck_width=bottleneck_width, stride=stride)
    # bf16 weights + bf16 intermediate activations vs. full-f32 reference.
    np.testing.assert_allclose(np.asarray(out), np.asarray(ref),
                               rtol=5e-2, atol=5e-2)
    assert out.shape == (N, 2 * cardinality * bottleneck_width, H, W)
    print("KERNEL_OK")
</pallas_src>

<mosaic_0001>
module attributes {stable_mosaic.version = 11 : i64} {
  func.func @_conv1x1_bn_relu_kernel(%arg0: i32, %arg1: memref<1024x8xf32, #tpu.memory_space<vmem>>, %arg2: memref<8x8xbf16, #tpu.memory_space<vmem>>, %arg3: memref<1x8xf32, #tpu.memory_space<vmem>>, %arg4: memref<1x8xf32, #tpu.memory_space<vmem>>, %arg5: memref<1024x8xbf16, #tpu.memory_space<vmem>>) attributes {dimension_semantics = [#tpu.dimension_semantics<parallel>], iteration_bounds = array<i64: 2>, scalar_prefetch = 0 : i64, scratch_operands = 0 : i64, tpu.core_type = #tpu.core_type<tc>, window_params = [{transform_indices = @transform_0, window_bounds = array<i64: 1024, 8>}, {pipeline_mode = #tpu.pipeline_mode<synchronous>, transform_indices = @transform_1, window_bounds = array<i64: 8, 8>}, {pipeline_mode = #tpu.pipeline_mode<synchronous>, transform_indices = @transform_2, window_bounds = array<i64: 1, 8>}, {pipeline_mode = #tpu.pipeline_mode<synchronous>, transform_indices = @transform_3, window_bounds = array<i64: 1, 8>}, {transform_indices = @transform_4, window_bounds = array<i64: 1024, 8>}]} {
    %c0 = arith.constant 0 : index
    %c0_0 = arith.constant 0 : index
    %0 = vector.load %arg1[%c0, %c0_0] : memref<1024x8xf32, #tpu.memory_space<vmem>>, vector<1024x8xf32>
    %1 = arith.truncf %0 : vector<1024x8xf32> to vector<1024x8xbf16>
    %c0_1 = arith.constant 0 : index
    %c0_2 = arith.constant 0 : index
    %2 = vector.load %arg2[%c0_1, %c0_2] : memref<8x8xbf16, #tpu.memory_space<vmem>>, vector<8x8xbf16>
    %cst = arith.constant dense<0.000000e+00> : vector<1024x8xf32>
    %3 = tpu.matmul %1, %2, %cst {dimension_numbers = #tpu.dot_dimension_numbers<[1], [0], [0], [1], [0, 0, 1, 1], [], []>} : vector<1024x8xbf16>, vector<8x8xbf16>, vector<1024x8xf32> -> vector<1024x8xf32>
    %c0_3 = arith.constant 0 : index
    %c0_4 = arith.constant 0 : index
    %4 = vector.load %arg3[%c0_3, %c0_4] : memref<1x8xf32, #tpu.memory_space<vmem>>, vector<1x8xf32>
    %5 = vector.broadcast %4 : vector<1x8xf32> to vector<1024x8xf32>
    %6 = arith.mulf %3, %5 : vector<1024x8xf32>
    %c0_5 = arith.constant 0 : index
    %c0_6 = arith.constant 0 : index
    %7 = vector.load %arg4[%c0_5, %c0_6] : memref<1x8xf32, #tpu.memory_space<vmem>>, vector<1x8xf32>
    %8 = vector.broadcast %7 : vector<1x8xf32> to vector<1024x8xf32>
    %9 = arith.addf %6, %8 : vector<1024x8xf32>
    %cst_7 = arith.constant 0.000000e+00 : f32
    %10 = vector.broadcast %cst_7 : f32 to vector<1024x8xf32>
    %11 = arith.maximumf %9, %10 : vector<1024x8xf32>
    %12 = arith.truncf %11 : vector<1024x8xf32> to vector<1024x8xbf16>
    %c0_8 = arith.constant 0 : index
    %c0_9 = arith.constant 0 : index
    %13 = vector.load %arg5[%c0_8, %c0_9] : memref<1024x8xbf16, #tpu.memory_space<vmem>>, vector<1024x8xbf16>
    tpu.vector_store %arg5[%c0_8, %c0_9], %12 {strides = array<i32>} : memref<1024x8xbf16, #tpu.memory_space<vmem>>, vector<1024x8xbf16>,
    return
  }
  func.func @transform_0(%arg0: i32) -> (i32, i32) {
    %c0_i32 = arith.constant 0 : i32
    %c0_i32_0 = arith.constant 0 : i32
    return %arg0, %c0_i32 : i32, i32
  }
  func.func @transform_1(%arg0: i32) -> (i32, i32) {
    %c0_i32 = arith.constant 0 : i32
    %c0_i32_0 = arith.constant 0 : i32
    %c0_i32_1 = arith.constant 0 : i32
    return %c0_i32, %c0_i32_0 : i32, i32
  }
  func.func @transform_2(%arg0: i32) -> (i32, i32) {
    %c0_i32 = arith.constant 0 : i32
    %c0_i32_0 = arith.constant 0 : i32
    %c0_i32_1 = arith.constant 0 : i32
    return %c0_i32, %c0_i32_0 : i32, i32
  }
  func.func @transform_3(%arg0: i32) -> (i32, i32) {
    %c0_i32 = arith.constant 0 : i32
    %c0_i32_0 = arith.constant 0 : i32
    %c0_i32_1 = arith.constant 0 : i32
    return %c0_i32, %c0_i32_0 : i32, i32
  }
  func.func @transform_4(%arg0: i32) -> (i32, i32) {
    %c0_i32 = arith.constant 0 : i32
    %c0_i32_0 = arith.constant 0 : i32
    return %arg0, %c0_i32 : i32, i32
  }
}

</mosaic_0001>

<bundles_post_ra>
// kernel: tpu_custom_call.1
= control target key start
LH: loop header
LB: loop body
LE: loop exit
PB: predicated region body
PF: predicated region fallthrough
CT: control target
= control target key end

     0   :  { %s2807_s15 = smov 0   ;;  %s3559_s0 = inlined_call_operand.vmem [shape: f32[2048,8], index: 0, kind: input, shape index: {}]   ;;  %s3560_s1 = inlined_call_operand.vmem [shape: bf16[8,8], index: 1, kind: input, shape index: {}]   ;;  %s3561_s2 = inlined_call_operand.vmem [shape: f32[1,8], index: 2, kind: input, shape index: {}]   ;;  %s3562_s3 = inlined_call_operand.vmem [shape: f32[1,8], index: 3, kind: input, shape index: {}]   ;;  %s3563_s4 = inlined_call_operand.vmem [shape: bf16[2048,8], index: 4, kind: output, shape index: {}]  }
   0x1 LB: > { %s2232_s16 = sadd.s32 4294967295, %s2780_s15   ;;  %p2236_p0 = scmp.ge.s32.totalorder %s2780_s15, 1  ;;  %s2780_s15 = sphi %s2807_s15, %s14_s15  }
   0x2   : > { %p163_p1 = scmp.lt.s32.totalorder %s2780_s15, 3 }
   0x4   : > { %p164_p2 = pnand %p2236_p0, %p163_p1 }
   0x5   : > { %v394_v0 = vld [vmem:[%s3560_s1] sm:$0xf] (!%p164_p2)  ;;  %vm588_vm0 = vcmask (!%p164_p2), 1043456   ;;  %s2237_s19 = sshll.u32 (!%p164_p2), %s2232_s16, 7  ;;  %vm395_vm1 = vcmask (!%p164_p2), 64512   ;;  %vm2047_vm2 = vcmask (!%p164_p2), 60416  }
   0x6   : > { %167 = sbr.rel (%p164_p2) target bundleno = 368 (0x170), region = 36  ;;  %2762 = vmatprep.subr.msk.bf16.mxu0 (!%p164_p2), %vm588_vm0, %v394_v0  ;;  %2763 = vmatprep.subr.msk.bf16.mxu1 (!%p164_p2), %vm588_vm0, %v394_v0  ;;  %v590_v1 = vsel (!%p164_p2), %vm588_vm0, %v394_v0, 0  ;;  %p190_p3 = scmp.lt.s32.totalorder (!%p164_p2), %s2237_s19, 255 }
   0x7   : > { %2631 = vmatpush3.bf16.msra.mxu0 (!%p164_p2), %v590_v1  ;;  %2761 = vmatpush3.bf16.msra.mxu1 (!%p164_p2), %v590_v1 }
   0xd   : > { %s3565_s19 = smov (!%p190_p3, %s2237_s19), 255 }
   0xe   : > { %s2238_s20 = sshll.u32 %s3565_s19, 3  ;;  %s2240_s28 = sshll.u32 %s3565_s19, 2 }
   0xf   : > { %s2824_s23 = scalar_lea.vmem %s3559_s0, %s2238_s20  ;;  %s3045_s5 = scalar_lea.vmem %s3563_s4, %s2240_s28 }
  0x10   : > { %v202_v2 = vld [vmem:[%s2824_s23] sm:$0xff]  ;;  %v203_v3 = vld [vmem:[%s2824_s23 + $0x8] sm:$0xff]  ;;  %v204_v7 = vld [vmem:[%s2824_s23 + $0x10] sm:$0xff] }
  0x11   : > { %v266_v4 = vld [vmem:[%s2824_s23 + $0x200] sm:$0xff]  ;;  %v330_v5 = vpack.c.bf16 %v203_v3, %v202_v2  ;;  %v267_v6 = vld [vmem:[%s2824_s23 + $0x208] sm:$0xff]  ;;  %v205_v8 = vld [vmem:[%s2824_s23 + $0x18] sm:$0xff] }
  0x12   : > { %v362_v9 = vpack.c.bf16 %v267_v6, %v266_v4  ;;  %v331_v10 = vpack.c.bf16 %v205_v8, %v204_v7  ;;  %v268_v11 = vld [vmem:[%s2824_s23 + $0x210] sm:$0xff]  ;;  %v269_v12 = vld [vmem:[%s2824_s23 + $0x218] sm:$0xff]  ;;  %v206_v13 = vld [vmem:[%s2824_s23 + $0x20] sm:$0xff] }
  0x13   : > { %2632 = vmatprep.mubr.msk.bf16.mxu0 %vm395_vm1, %v330_v5  ;;  %v363_v14 = vpack.c.bf16 %v269_v12, %v268_v11  ;;  %v207_v15 = vld [vmem:[%s2824_s23 + $0x28] sm:$0xff]  ;;  %v270_v16 = vld [vmem:[%s2824_s23 + $0x220] sm:$0xff]  ;;  %v208_v20 = vld [vmem:[%s2824_s23 + $0x30] sm:$0xff] }
  0x14   : > { %v271_v17 = vld [vmem:[%s2824_s23 + $0x228] sm:$0xff]  ;;  %2696 = vmatprep.mubr.msk.bf16.mxu1 %vm395_vm1, %v362_v9  ;;  %2633 = vmatmul.mubr.msk.bf16.vlgmr.msra.gmra.mrb[0].mxu0 %vm395_vm1, %v331_v10  ;;  %v332_v18 = vpack.c.bf16 %v207_v15, %v206_v13  ;;  %v209_v21 = vld [vmem:[%s2824_s23 + $0x38] sm:$0xff]  ;;  %v272_v22 = vld [vmem:[%s2824_s23 + $0x230] sm:$0xff] }
  0x15   : > { %v364_v19 = vpack.c.bf16 %v271_v17, %v270_v16  ;;  %2697 = vmatmul.mubr.msk.bf16.vlgmr.msra.gmra.mrb[0].mxu1 %vm395_vm1, %v363_v14  ;;  %v273_v23 = vld [vmem:[%s2824_s23 + $0x238] sm:$0xff]  ;;  %v210_v24 = vld [vmem:[%s2824_s23 + $0x40] sm:$0xff]  ;;  %v211_v25 = vld [vmem:[%s2824_s23 + $0x48] sm:$0xff]  ;;  %v333_v28 = vpack.c.bf16 %v209_v21, %v208_v20 }
  0x16   : > { %2636 = vmatprep.mubr.msk.bf16.mxu0 %vm395_vm1, %v332_v18  ;;  %v274_v26 = vld [vmem:[%s2824_s23 + $0x240] sm:$0xff]  ;;  %v275_v27 = vld [vmem:[%s2824_s23 + $0x248] sm:$0xff]  ;;  %v365_v29 = vpack.c.bf16 %v273_v23, %v272_v22  ;;  %v334_v30 = vpack.c.bf16 %v211_v25, %v210_v24  ;;  %v212_v32 = vld [vmem:[%s2824_s23 + $0x50] sm:$0xff] }
  0x17   : > { %2700 = vmatprep.mubr.msk.bf16.mxu1 %vm395_vm1, %v364_v19  ;;  %v366_v31 = vpack.c.bf16 %v275_v27, %v274_v26  ;;  %v213_v33 = vld [vmem:[%s2824_s23 + $0x58] sm:$0xff]  ;;  %v276_v34 = vld [vmem:[%s2824_s23 + $0x250] sm:$0xff]  ;;  %v214_v36 = vld [vmem:[%s2824_s23 + $0x60] sm:$0xff] }
  0x18   : > { %v277_v35 = vld [vmem:[%s2824_s23 + $0x258] sm:$0xff]  ;;  %v215_v37 = vld [vmem:[%s2824_s23 + $0x68] sm:$0xff]  ;;  %v278_v38 = vld [vmem:[%s2824_s23 + $0x260] sm:$0xff]  ;;  %v335_v40 = vpack.c.bf16 %v213_v33, %v212_v32 }
  0x19   : > { %v279_v39 = vld [vmem:[%s2824_s23 + $0x268] sm:$0xff]  ;;  %v367_v41 = vpack.c.bf16 %v277_v35, %v276_v34  ;;  %v336_v42 = vpack.c.bf16 %v215_v37, %v214_v36  ;;  %v216_v44 = vld [vmem:[%s2824_s23 + $0x70] sm:$0xff]  ;;  %v217_v45 = vld [vmem:[%s2824_s23 + $0x78] sm:$0xff] }
  0x1a   : > { %v368_v43 = vpack.c.bf16 %v279_v39, %v278_v38  ;;  %v280_v46 = vld [vmem:[%s2824_s23 + $0x270] sm:$0xff]  ;;  %v281_v47 = vld [vmem:[%s2824_s23 + $0x278] sm:$0xff]  ;;  %v218_v48 = vld [vmem:[%s2824_s23 + $0x80] sm:$0xff]  ;;  %v337_v52 = vpack.c.bf16 %v217_v45, %v216_v44 }
  0x1b   : > { %v219_v49 = vld [vmem:[%s2824_s23 + $0x88] sm:$0xff]  ;;  %v282_v50 = vld [vmem:[%s2824_s23 + $0x280] sm:$0xff]  ;;  %v369_v53 = vpack.c.bf16 %v281_v47, %v280_v46  ;;  %v220_v56 = vld [vmem:[%s2824_s23 + $0x90] sm:$0xff] }
  0x1c   : > { %2637 = vmatmul.mubr.msk.bf16.gmra.mrb[4].mxu0 %vm395_vm1, %v333_v28  ;;  %v283_v51 = vld [vmem:[%s2824_s23 + $0x288] sm:$0xff]  ;;  %v338_v54 = vpack.c.bf16 %v219_v49, %v218_v48  ;;  %v221_v57 = vld [vmem:[%s2824_s23 + $0x98] sm:$0xff]  ;;  %v284_v58 = vld [vmem:[%s2824_s23 + $0x290] sm:$0xff] }
  0x1d   : > { %2701 = vmatmul.mubr.msk.bf16.gmra.mrb[4].mxu1 %vm395_vm1, %v365_v29  ;;  %2640 = vmatprep.mubr.msk.bf16.mxu0 %vm395_vm1, %v334_v30  ;;  %v370_v55 = vpack.c.bf16 %v283_v51, %v282_v50  ;;  %v285_v59 = vld [vmem:[%s2824_s23 + $0x298] sm:$0xff]  ;;  %v222_v60 = vld [vmem:[%s2824_s23 + $0xa0] sm:$0xff]  ;;  %v223_v61 = vld [vmem:[%s2824_s23 + $0xa8] sm:$0xff]  ;;  %v339_v0 = vpack.c.bf16 %v221_v57, %v220_v56 }
  0x1e   : > { %2704 = vmatprep.mubr.msk.bf16.mxu1 %vm395_vm1, %v366_v31  ;;  %v286_v62 = vld [vmem:[%s2824_s23 + $0x2a0] sm:$0xff]  ;;  %v287_v63 = vld [vmem:[%s2824_s23 + $0x2a8] sm:$0xff]  ;;  %v371_v1 = vpack.c.bf16 %v285_v59, %v284_v58  ;;  %v340_v2 = vpack.c.bf16 %v223_v61, %v222_v60  ;;  %v224_v4 = vld [vmem:[%s2824_s23 + $0xb0] sm:$0xff] }
  0x1f   : > { %v372_v3 = vpack.c.bf16 %v287_v63, %v286_v62  ;;  %v225_v5 = vld [vmem:[%s2824_s23 + $0xb8] sm:$0xff]  ;;  %v288_v6 = vld [vmem:[%s2824_s23 + $0x2b0] sm:$0xff]  ;;  %v226_v8 = vld [vmem:[%s2824_s23 + $0xc0] sm:$0xff] }
  0x20   : > { %v289_v7 = vld [vmem:[%s2824_s23 + $0x2b8] sm:$0xff]  ;;  %v227_v9 = vld [vmem:[%s2824_s23 + $0xc8] sm:$0xff]  ;;  %v290_v10 = vld [vmem:[%s2824_s23 + $0x2c0] sm:$0xff]  ;;  %v341_v12 = vpack.c.bf16 %v225_v5, %v224_v4 }
  0x21   : > { %v291_v11 = vld [vmem:[%s2824_s23 + $0x2c8] sm:$0xff]  ;;  %v373_v13 = vpack.c.bf16 %v289_v7, %v288_v6  ;;  %v342_v14 = vpack.c.bf16 %v227_v9, %v226_v8  ;;  %v228_v16 = vld [vmem:[%s2824_s23 + $0xd0] sm:$0xff]  ;;  %v229_v17 = vld [vmem:[%s2824_s23 + $0xd8] sm:$0xff] }
  0x22   : > { %v374_v15 = vpack.c.bf16 %v291_v11, %v290_v10  ;;  %v292_v18 = vld [vmem:[%s2824_s23 + $0x2d0] sm:$0xff]  ;;  %v293_v19 = vld [vmem:[%s2824_s23 + $0x2d8] sm:$0xff]  ;;  %v230_v20 = vld [vmem:[%s2824_s23 + $0xe0] sm:$0xff]  ;;  %v343_v24 = vpack.c.bf16 %v229_v17, %v228_v16 }
  0x23   : > { %v231_v21 = vld [vmem:[%s2824_s23 + $0xe8] sm:$0xff]  ;;  %v294_v22 = vld [vmem:[%s2824_s23 + $0x2e0] sm:$0xff]  ;;  %v375_v25 = vpack.c.bf16 %v293_v19, %v292_v18  ;;  %v232_v28 = vld [vmem:[%s2824_s23 + $0xf0] sm:$0xff] }
  0x24   : > { %2641 = vmatmul.mubr.msk.bf16.gmra.mrb[8].mxu0 %vm395_vm1, %v335_v40  ;;  %v295_v23 = vld [vmem:[%s2824_s23 + $0x2e8] sm:$0xff]  ;;  %v344_v26 = vpack.c.bf16 %v231_v21, %v230_v20  ;;  %v233_v29 = vld [vmem:[%s2824_s23 + $0xf8] sm:$0xff]  ;;  %v296_v30 = vld [vmem:[%s2824_s23 + $0x2f0] sm:$0xff] }
  0x25   : > { %2705 = vmatmul.mubr.msk.bf16.gmra.mrb[8].mxu1 %vm395_vm1, %v367_v41  ;;  %2644 = vmatprep.mubr.msk.bf16.mxu0 %vm395_vm1, %v336_v42  ;;  %v376_v27 = vpack.c.bf16 %v295_v23, %v294_v22  ;;  %v297_v31 = vld [vmem:[%s2824_s23 + $0x2f8] sm:$0xff]  ;;  %v234_v32 = vld [vmem:[%s2824_s23 + $0x100] sm:$0xff]  ;;  %v235_v33 = vld [vmem:[%s2824_s23 + $0x108] sm:$0xff]  ;;  %v345_v36 = vpack.c.bf16 %v233_v29, %v232_v28 }
  0x26   : > { %2708 = vmatprep.mubr.msk.bf16.mxu1 %vm395_vm1, %v368_v43  ;;  %v298_v34 = vld [vmem:[%s2824_s23 + $0x300] sm:$0xff]  ;;  %v299_v35 = vld [vmem:[%s2824_s23 + $0x308] sm:$0xff]  ;;  %v377_v37 = vpack.c.bf16 %v297_v31, %v296_v30  ;;  %v346_v38 = vpack.c.bf16 %v235_v33, %v234_v32  ;;  %v236_v40 = vld [vmem:[%s2824_s23 + $0x110] sm:$0xff] }
  0x27   : > { %v378_v39 = vpack.c.bf16 %v299_v35, %v298_v34  ;;  %v237_v41 = vld [vmem:[%s2824_s23 + $0x118] sm:$0xff]  ;;  %v300_v42 = vld [vmem:[%s2824_s23 + $0x310] sm:$0xff]  ;;  %v238_v44 = vld [vmem:[%s2824_s23 + $0x120] sm:$0xff] }
  0x28   : > { %v301_v43 = vld [vmem:[%s2824_s23 + $0x318] sm:$0xff]  ;;  %v239_v45 = vld [vmem:[%s2824_s23 + $0x128] sm:$0xff]  ;;  %v302_v46 = vld [vmem:[%s2824_s23 + $0x320] sm:$0xff]  ;;  %v347_v48 = vpack.c.bf16 %v237_v41, %v236_v40 }
  0x29   : > { %v303_v47 = vld [vmem:[%s2824_s23 + $0x328] sm:$0xff]  ;;  %v379_v49 = vpack.c.bf16 %v301_v43, %v300_v42  ;;  %v348_v50 = vpack.c.bf16 %v239_v45, %v238_v44  ;;  %v242_v56 = vld [vmem:[%s2824_s23 + $0x140] sm:$0xff] }
  0x2a   : > { %v380_v51 = vpack.c.bf16 %v303_v47, %v302_v46  ;;  %v243_v57 = vld [vmem:[%s2824_s23 + $0x148] sm:$0xff]  ;;  %v306_v58 = vld [vmem:[%s2824_s23 + $0x340] sm:$0xff] }
  0x2b   : > { %v307_v59 = vld [vmem:[%s2824_s23 + $0x348] sm:$0xff]  ;;  %v350_v62 = vpack.c.bf16 %v243_v57, %v242_v56  ;;  %v246_v4 = vld [vmem:[%s2824_s23 + $0x160] sm:$0xff] }
  0x2c   : > { %2645 = vmatmul.mubr.msk.bf16.gmra.mrb[12].mxu0 %vm395_vm1, %v337_v52  ;;  %v240_v52 = vld [vmem:[%s2824_s23 + $0x130] sm:$0xff]  ;;  %v382_v63 = vpack.c.bf16 %v307_v59, %v306_v58  ;;  %v247_v5 = vld [vmem:[%s2824_s23 + $0x168] sm:$0xff]  ;;  %v310_v6 = vld [vmem:[%s2824_s23 + $0x360] sm:$0xff] }
  0x2d   : > { %2709 = vmatmul.mubr.msk.bf16.gmra.mrb[12].mxu1 %vm395_vm1, %v369_v53  ;;  %2648 = vmatprep.mubr.msk.bf16.mxu0 %vm395_vm1, %v338_v54  ;;  %v241_v53 = vld [vmem:[%s2824_s23 + $0x138] sm:$0xff]  ;;  %v304_v54 = vld [vmem:[%s2824_s23 + $0x330] sm:$0xff]  ;;  %v311_v7 = vld [vmem:[%s2824_s23 + $0x368] sm:$0xff]  ;;  %v352_v10 = vpack.c.bf16 %v247_v5, %v246_v4 }
  0x2e   : > { %2712 = vmatprep.mubr.msk.bf16.mxu1 %vm395_vm1, %v370_v55  ;;  %v305_v55 = vld [vmem:[%s2824_s23 + $0x338] sm:$0xff]  ;;  %v349_v60 = vpack.c.bf16 %v241_v53, %v240_v52  ;;  %v384_v11 = vpack.c.bf16 %v311_v7, %v310_v6  ;;  %v250_v16 = vld [vmem:[%s2824_s23 + $0x180] sm:$0xff]  ;;  %v251_v17 = vld [vmem:[%s2824_s23 + $0x188] sm:$0xff] }
  0x2f   : > { %v381_v61 = vpack.c.bf16 %v305_v55, %v304_v54  ;;  %v314_v18 = vld [vmem:[%s2824_s23 + $0x380] sm:$0xff]  ;;  %v315_v19 = vld [vmem:[%s2824_s23 + $0x388] sm:$0xff]  ;;  %v354_v22 = vpack.c.bf16 %v251_v17, %v250_v16 }
  0x30   : > { %v386_v23 = vpack.c.bf16 %v315_v19, %v314_v18  ;;  %v254_v28 = vld [vmem:[%s2824_s23 + $0x1a0] sm:$0xff]  ;;  %v255_v29 = vld [vmem:[%s2824_s23 + $0x1a8] sm:$0xff] }
  0x31   : > { %v318_v30 = vld [vmem:[%s2824_s23 + $0x3a0] sm:$0xff]  ;;  %v319_v31 = vld [vmem:[%s2824_s23 + $0x3a8] sm:$0xff]  ;;  %v356_v34 = vpack.c.bf16 %v255_v29, %v254_v28 }
  0x32   : > { %v388_v35 = vpack.c.bf16 %v319_v31, %v318_v30  ;;  %v258_v40 = vld [vmem:[%s2824_s23 + $0x1c0] sm:$0xff]  ;;  %v259_v41 = vld [vmem:[%s2824_s23 + $0x1c8] sm:$0xff] }
  0x33   : > { %v322_v42 = vld [vmem:[%s2824_s23 + $0x3c0] sm:$0xff]  ;;  %v323_v43 = vld [vmem:[%s2824_s23 + $0x3c8] sm:$0xff]  ;;  %v358_v46 = vpack.c.bf16 %v259_v41, %v258_v40 }
  0x34   : > { %2649 = vmatmul.mubr.msk.bf16.gmra.mrb[16].mxu0 %vm395_vm1, %v339_v0  ;;  %v244_v0 = vld [vmem:[%s2824_s23 + $0x150] sm:$0xff]  ;;  %v390_v47 = vpack.c.bf16 %v323_v43, %v322_v42  ;;  %v262_v52 = vld [vmem:[%s2824_s23 + $0x1e0] sm:$0xff]  ;;  %v263_v53 = vld [vmem:[%s2824_s23 + $0x1e8] sm:$0xff] }
  0x35   : > { %2713 = vmatmul.mubr.msk.bf16.gmra.mrb[16].mxu1 %vm395_vm1, %v371_v1  ;;  %2652 = vmatprep.mubr.msk.bf16.mxu0 %vm395_vm1, %v340_v2  ;;  %v245_v1 = vld [vmem:[%s2824_s23 + $0x158] sm:$0xff]  ;;  %v308_v2 = vld [vmem:[%s2824_s23 + $0x350] sm:$0xff]  ;;  %v326_v54 = vld [vmem:[%s2824_s23 + $0x3e0] sm:$0xff]  ;;  %v360_v58 = vpack.c.bf16 %v263_v53, %v262_v52 }
  0x36   : > { %2716 = vmatprep.mubr.msk.bf16.mxu1 %vm395_vm1, %v372_v3  ;;  %v309_v3 = vld [vmem:[%s2824_s23 + $0x358] sm:$0xff]  ;;  %v351_v8 = vpack.c.bf16 %v245_v1, %v244_v0  ;;  %v327_v55 = vld [vmem:[%s2824_s23 + $0x3e8] sm:$0xff]  ;;  %v3026_v4 = vld [vmem:[%s3562_s3] ss:$0 sm:$0xff] }
  0x37   : > { %v383_v9 = vpack.c.bf16 %v309_v3, %v308_v2  ;;  %v392_v59 = vpack.c.bf16 %v327_v55, %v326_v54  ;;  %v3021_v2 = vld [vmem:[%s3561_s2] ss:$0 sm:$0xff] }
  0x3c   : > { %2653 = vmatmul.mubr.msk.bf16.gmra.mrb[20].mxu0 %vm395_vm1, %v341_v12  ;;  %v248_v12 = vld [vmem:[%s2824_s23 + $0x170] sm:$0xff] }
  0x3d   : > { %2717 = vmatmul.mubr.msk.bf16.gmra.mrb[20].mxu1 %vm395_vm1, %v373_v13  ;;  %2656 = vmatprep.mubr.msk.bf16.mxu0 %vm395_vm1, %v342_v14  ;;  %v249_v13 = vld [vmem:[%s2824_s23 + $0x178] sm:$0xff]  ;;  %v312_v14 = vld [vmem:[%s2824_s23 + $0x370] sm:$0xff] }
  0x3e   : > { %2720 = vmatprep.mubr.msk.bf16.mxu1 %vm395_vm1, %v374_v15  ;;  %v313_v15 = vld [vmem:[%s2824_s23 + $0x378] sm:$0xff]  ;;  %v353_v20 = vpack.c.bf16 %v249_v13, %v248_v12 }
  0x3f   : > { %v385_v21 = vpack.c.bf16 %v313_v15, %v312_v14 }
  0x44   : > { %2657 = vmatmul.mubr.msk.bf16.gmra.mrb[24].mxu0 %vm395_vm1, %v343_v24  ;;  %v252_v24 = vld [vmem:[%s2824_s23 + $0x190] sm:$0xff] }
  0x45   : > { %2721 = vmatmul.mubr.msk.bf16.gmra.mrb[24].mxu1 %vm395_vm1, %v375_v25  ;;  %2660 = vmatprep.mubr.msk.bf16.mxu0 %vm395_vm1, %v344_v26  ;;  %v253_v25 = vld [vmem:[%s2824_s23 + $0x198] sm:$0xff]  ;;  %v316_v26 = vld [vmem:[%s2824_s23 + $0x390] sm:$0xff] }
  0x46   : > { %2724 = vmatprep.mubr.msk.bf16.mxu1 %vm395_vm1, %v376_v27  ;;  %v317_v27 = vld [vmem:[%s2824_s23 + $0x398] sm:$0xff]  ;;  %v355_v32 = vpack.c.bf16 %v253_v25, %v252_v24 }
  0x47   : > { %v387_v33 = vpack.c.bf16 %v317_v27, %v316_v26 }
  0x4c   : > { %2661 = vmatmul.mubr.msk.bf16.gmra.mrb[28].mxu0 %vm395_vm1, %v345_v36  ;;  %v256_v36 = vld [vmem:[%s2824_s23 + $0x1b0] sm:$0xff] }
  0x4d   : > { %2725 = vmatmul.mubr.msk.bf16.gmra.mrb[28].mxu1 %vm395_vm1, %v377_v37  ;;  %2664 = vmatprep.mubr.msk.bf16.mxu0 %vm395_vm1, %v346_v38  ;;  %v257_v37 = vld [vmem:[%s2824_s23 + $0x1b8] sm:$0xff]  ;;  %v320_v38 = vld [vmem:[%s2824_s23 + $0x3b0] sm:$0xff] }
  0x4e   : > { %2728 = vmatprep.mubr.msk.bf16.mxu1 %vm395_vm1, %v378_v39  ;;  %v321_v39 = vld [vmem:[%s2824_s23 + $0x3b8] sm:$0xff]  ;;  %v357_v44 = vpack.c.bf16 %v257_v37, %v256_v36 }
  0x4f   : > { %v389_v45 = vpack.c.bf16 %v321_v39, %v320_v38 }
  0x54   : > { %2665 = vmatmul.mubr.msk.bf16.gmra.mrb[32].mxu0 %vm395_vm1, %v347_v48  ;;  %v260_v48 = vld [vmem:[%s2824_s23 + $0x1d0] sm:$0xff] }
  0x55   : > { %2729 = vmatmul.mubr.msk.bf16.gmra.mrb[32].mxu1 %vm395_vm1, %v379_v49  ;;  %2668 = vmatprep.mubr.msk.bf16.mxu0 %vm395_vm1, %v348_v50  ;;  %v261_v49 = vld [vmem:[%s2824_s23 + $0x1d8] sm:$0xff]  ;;  %v324_v50 = vld [vmem:[%s2824_s23 + $0x3d0] sm:$0xff] }
  0x56   : > { %2732 = vmatprep.mubr.msk.bf16.mxu1 %vm395_vm1, %v380_v51  ;;  %v325_v51 = vld [vmem:[%s2824_s23 + $0x3d8] sm:$0xff]  ;;  %v359_v56 = vpack.c.bf16 %v261_v49, %v260_v48 }
  0x57   : > { %v391_v57 = vpack.c.bf16 %v325_v51, %v324_v50 }
  0x5c   : > { %2669 = vmatmul.mubr.msk.bf16.gmra.mrb[36].mxu0 %vm395_vm1, %v349_v60  ;;  %v264_v60 = vld [vmem:[%s2824_s23 + $0x1f0] sm:$0xff] }
  0x5d   : > { %2733 = vmatmul.mubr.msk.bf16.gmra.mrb[36].mxu1 %vm395_vm1, %v381_v61  ;;  %2672 = vmatprep.mubr.msk.bf16.mxu0 %vm395_vm1, %v350_v62  ;;  %v265_v61 = vld [vmem:[%s2824_s23 + $0x1f8] sm:$0xff]  ;;  %v328_v62 = vld [vmem:[%s2824_s23 + $0x3f0] sm:$0xff] }
  0x5e   : > { %2736 = vmatprep.mubr.msk.bf16.mxu1 %vm395_vm1, %v382_v63  ;;  %v329_v63 = vld [vmem:[%s2824_s23 + $0x3f8] sm:$0xff]  ;;  %v361_v0 = vpack.c.bf16 %v265_v61, %v264_v60 }
  0x5f   : > { %v393_v1 = vpack.c.bf16 %v329_v63, %v328_v62 }
  0x64   : > { %2673 = vmatmul.mubr.msk.bf16.gmra.mrb[40].mxu0 %vm395_vm1, %v351_v8 }
  0x65   : > { %2737 = vmatmul.mubr.msk.bf16.gmra.mrb[40].mxu1 %vm395_vm1, %v383_v9  ;;  %2676 = vmatprep.mubr.msk.bf16.mxu0 %vm395_vm1, %v352_v10 }
  0x66   : > { %2740 = vmatprep.mubr.msk.bf16.mxu1 %vm395_vm1, %v384_v11 }
  0x6c   : > { %2677 = vmatmul.mubr.msk.bf16.gmra.mrb[44].mxu0 %vm395_vm1, %v353_v20 }
  0x6d   : > { %2741 = vmatmul.mubr.msk.bf16.gmra.mrb[44].mxu1 %vm395_vm1, %v385_v21  ;;  %2680 = vmatprep.mubr.msk.bf16.mxu0 %vm395_vm1, %v354_v22 }
  0x6e   : > { %2744 = vmatprep.mubr.msk.bf16.mxu1 %vm395_vm1, %v386_v23 }
  0x74   : > { %2681 = vmatmul.mubr.msk.bf16.gmra.mrb[48].mxu0 %vm395_vm1, %v355_v32 }
  0x75   : > { %2745 = vmatmul.mubr.msk.bf16.gmra.mrb[48].mxu1 %vm395_vm1, %v387_v33  ;;  %2684 = vmatprep.mubr.msk.bf16.mxu0 %vm395_vm1, %v356_v34 }
  0x76   : > { %2748 = vmatprep.mubr.msk.bf16.mxu1 %vm395_vm1, %v388_v35 }
  0x7c   : > { %2685 = vmatmul.mubr.msk.bf16.gmra.mrb[52].mxu0 %vm395_vm1, %v357_v44 }
  0x7d   : > { %2749 = vmatmul.mubr.msk.bf16.gmra.mrb[52].mxu1 %vm395_vm1, %v389_v45  ;;  %2688 = vmatprep.mubr.msk.bf16.mxu0 %vm395_vm1, %v358_v46 }
  0x7e   : > { %2752 = vmatprep.mubr.msk.bf16.mxu1 %vm395_vm1, %v390_v47 }
  0x84   : > { %2689 = vmatmul.mubr.msk.bf16.gmra.mrb[56].mxu0 %vm395_vm1, %v359_v56 }
  0x85   : > { %2753 = vmatmul.mubr.msk.bf16.gmra.mrb[56].mxu1 %vm395_vm1, %v391_v57  ;;  %2692 = vmatprep.mubr.msk.bf16.mxu0 %vm395_vm1, %v360_v58 }
  0x86   : > { %2756 = vmatprep.mubr.msk.bf16.mxu1 %vm395_vm1, %v392_v59 }
  0x8c   : > { %2693 = vmatmul.mubr.msk.bf16.gmra.mrb[60].mxu0 %vm395_vm1, %v361_v0 }
  0x8d   : > { %2757 = vmatmul.mubr.msk.bf16.gmra.mrb[60].mxu1 %vm395_vm1, %v393_v1 }
  0xe7   : > { %v2634_v3 = vpop.f32.mrb[0].mxu0 }
  0xe8   : > { %v1146_v5 = vmul.f32 %v2634_v3, %v3021_v2  ;;  %v2698_v6 = vpop.f32.mrb[0].mxu1  ;;  %v626_v7 = vpop.f32.mrb[1].mxu0 }
  0xe9   : > { %v1210_v8 = vmul.f32 %v2698_v6, %v3021_v2  ;;  %v1144_v9 = vmul.f32 %v3021_v2, %v626_v7  ;;  %v882_v10 = vpop.f32.mrb[1].mxu1  ;;  %v2635_v11 = vpop.f32.mrb[2].mxu0 }
  0xea   : > { %v1281_v12 = vadd.f32 %v3026_v4, %v1146_v5  ;;  %v1208_v13 = vmul.f32 %v3021_v2, %v882_v10  ;;  %v1147_v14 = vmul.f32 %v2635_v11, %v3021_v2  ;;  %v2699_v15 = vpop.f32.mrb[2].mxu1  ;;  %v629_v16 = vpop.f32.mrb[3].mxu0 }
  0xeb   : > { %v1345_v17 = vadd.f32 %v3026_v4, %v1210_v8  ;;  %v1279_v18 = vadd.f32 %v3026_v4, %v1144_v9  ;;  %v1211_v19 = vmul.f32 %v2699_v15, %v3021_v2  ;;  %v1145_v20 = vmul.f32 %v3021_v2, %v629_v16  ;;  %v885_v21 = vpop.f32.mrb[3].mxu1 }
  0xec   : > { %v1409_v22 = vmax.f32 %v1281_v12, 0.0  ;;  %v1343_v23 = vadd.f32 %v3026_v4, %v1208_v13  ;;  %v1282_v24 = vadd.f32 %v3026_v4, %v1147_v14  ;;  %v1209_v25 = vmul.f32 %v3021_v2, %v885_v21 }
  0xed   : > { %v1473_v26 = vmax.f32 %v1345_v17, 0.0  ;;  %v1407_v27 = vmax.f32 %v1279_v18, 0.0  ;;  %v1346_v28 = vadd.f32 %v3026_v4, %v1211_v19  ;;  %v1280_v29 = vadd.f32 %v3026_v4, %v1145_v20 }
  0xee   : > { %v2439_v30 = vpack.c.bf16 %v1409_v22, %v1409_v22  ;;  %v1471_v31 = vmax.f32 %v1343_v23, 0.0  ;;  %v1410_v32 = vmax.f32 %v1282_v24, 0.0  ;;  %v1344_v33 = vadd.f32 %v3026_v4, %v1209_v25 }
  0xef   : > { %v2503_v34 = vpack.c.bf16 %v1473_v26, %v1473_v26  ;;  %v2437_v35 = vpack.c.bf16 %v1407_v27, %v1407_v27  ;;  %v1474_v36 = vmax.f32 %v1346_v28, 0.0  ;;  %v1408_v37 = vmax.f32 %v1280_v29, 0.0  ;;  %v2638_v38 = vpop.f32.mrb[4].mxu0 }
  0xf0   : > { %2050 = vst.msk [vmem:[%s3045_s5 + $0x8] sm:$0xf] %vm2047_vm2, %v2439_v30  ;;  %v2501_v39 = vpack.c.bf16 %v1471_v31, %v1471_v31  ;;  %v2440_v40 = vpack.c.bf16 %v1410_v32, %v1410_v32  ;;  %v1472_v41 = vmax.f32 %v1344_v33, 0.0  ;;  %v1150_v42 = vmul.f32 %v2638_v38, %v3021_v2  ;;  %v2702_v43 = vpop.f32.mrb[4].mxu1  ;;  %v642_v44 = vpop.f32.mrb[5].mxu0 }
  0xf1   : > { %2114 = vst.msk [vmem:[%s3045_s5 + $0x108] sm:$0xf] %vm2047_vm2, %v2503_v34  ;;  %2048 = vst.msk [vmem:[%s3045_s5] sm:$0xf] %vm2047_vm2, %v2437_v35  ;;  %v2504_v45 = vpack.c.bf16 %v1474_v36, %v1474_v36  ;;  %v2438_v46 = vpack.c.bf16 %v1408_v37, %v1408_v37  ;;  %v1214_v47 = vmul.f32 %v2702_v43, %v3021_v2  ;;  %v898_v49 = vpop.f32.mrb[5].mxu1  ;;  %v2639_v50 = vpop.f32.mrb[6].mxu0 }
  0xf2   : > { %v1148_v48 = vmul.f32 %v3021_v2, %v642_v44  ;;  %2112 = vst.msk [vmem:[%s3045_s5 + $0x100] sm:$0xf] %vm2047_vm2, %v2501_v39  ;;  %2051 = vst.msk [vmem:[%s3045_s5 + $0xc] sm:$0xf] %vm2047_vm2, %v2440_v40  ;;  %v2502_v51 = vpack.c.bf16 %v1472_v41, %v1472_v41  ;;  %v1285_v52 = vadd.f32 %v3026_v4, %v1150_v42  ;;  %v2703_v55 = vpop.f32.mrb[6].mxu1  ;;  %v645_v56 = vpop.f32.mrb[7].mxu0 }
  0xf3   : > { %v1212_v53 = vmul.f32 %v3021_v2, %v898_v49  ;;  %v1151_v54 = vmul.f32 %v2639_v50, %v3021_v2  ;;  %2115 = vst.msk [vmem:[%s3045_s5 + $0x10c] sm:$0xf] %vm2047_vm2, %v2504_v45  ;;  %2049 = vst.msk [vmem:[%s3045_s5 + $0x4] sm:$0xf] %vm2047_vm2, %v2438_v46  ;;  %v1349_v57 = vadd.f32 %v3026_v4, %v1214_v47  ;;  %v901_v61 = vpop.f32.mrb[7].mxu1 }
  0xf4   : > { %v1283_v58 = vadd.f32 %v3026_v4, %v1148_v48  ;;  %v1215_v59 = vmul.f32 %v2703_v55, %v3021_v2  ;;  %v1149_v60 = vmul.f32 %v3021_v2, %v645_v56  ;;  %2113 = vst.msk [vmem:[%s3045_s5 + $0x104] sm:$0xf] %vm2047_vm2, %v2502_v51  ;;  %v1413_v62 = vmax.f32 %v1285_v52, 0.0 }
  0xf5   : > { %v1347_v63 = vadd.f32 %v3026_v4, %v1212_v53  ;;  %v1286_v0 = vadd.f32 %v3026_v4, %v1151_v54  ;;  %v1213_v1 = vmul.f32 %v3021_v2, %v901_v61  ;;  %v1477_v3 = vmax.f32 %v1349_v57, 0.0 }
  0xf6   : > { %v1411_v5 = vmax.f32 %v1283_v58, 0.0  ;;  %v1350_v6 = vadd.f32 %v3026_v4, %v1215_v59  ;;  %v1284_v7 = vadd.f32 %v3026_v4, %v1149_v60  ;;  %v2443_v8 = vpack.c.bf16 %v1413_v62, %v1413_v62 }
  0xf7   : > { %v1475_v9 = vmax.f32 %v1347_v63, 0.0  ;;  %v1414_v10 = vmax.f32 %v1286_v0, 0.0  ;;  %v1348_v11 = vadd.f32 %v3026_v4, %v1213_v1  ;;  %v2507_v12 = vpack.c.bf16 %v1477_v3, %v1477_v3  ;;  %v2642_v16 = vpop.f32.mrb[8].mxu0 }
  0xf8   : > { %v2441_v13 = vpack.c.bf16 %v1411_v5, %v1411_v5  ;;  %v1478_v14 = vmax.f32 %v1350_v6, 0.0  ;;  %v1412_v15 = vmax.f32 %v1284_v7, 0.0  ;;  %2054 = vst.msk [vmem:[%s3045_s5 + $0x18] sm:$0xf] %vm2047_vm2, %v2443_v8  ;;  %v1154_v20 = vmul.f32 %v2642_v16, %v3021_v2  ;;  %v2706_v21 = vpop.f32.mrb[8].mxu1  ;;  %v658_v22 = vpop.f32.mrb[9].mxu0 }
  0xf9   : > { %v2505_v17 = vpack.c.bf16 %v1475_v9, %v1475_v9  ;;  %v2444_v18 = vpack.c.bf16 %v1414_v10, %v1414_v10  ;;  %v1476_v19 = vmax.f32 %v1348_v11, 0.0  ;;  %2118 = vst.msk [vmem:[%s3045_s5 + $0x118] sm:$0xf] %vm2047_vm2, %v2507_v12  ;;  %v1218_v25 = vmul.f32 %v2706_v21, %v3021_v2  ;;  %v914_v27 = vpop.f32.mrb[9].mxu1  ;;  %v2643_v28 = vpop.f32.mrb[10].mxu0 }
  0xfa   : > { %2052 = vst.msk [vmem:[%s3045_s5 + $0x10] sm:$0xf] %vm2047_vm2, %v2441_v13  ;;  %v2508_v23 = vpack.c.bf16 %v1478_v14, %v1478_v14  ;;  %v2442_v24 = vpack.c.bf16 %v1412_v15, %v1412_v15  ;;  %v1152_v26 = vmul.f32 %v3021_v2, %v658_v22  ;;  %v1289_v30 = vadd.f32 %v3026_v4, %v1154_v20  ;;  %v2707_v33 = vpop.f32.mrb[10].mxu1  ;;  %v661_v34 = vpop.f32.mrb[11].mxu0 }
  0xfb   : > { %2116 = vst.msk [vmem:[%s3045_s5 + $0x110] sm:$0xf] %vm2047_vm2, %v2505_v17  ;;  %2055 = vst.msk [vmem:[%s3045_s5 + $0x1c] sm:$0xf] %vm2047_vm2, %v2444_v18  ;;  %v2506_v29 = vpack.c.bf16 %v1476_v19, %v1476_v19  ;;  %v1216_v31 = vmul.f32 %v3021_v2, %v914_v27  ;;  %v1155_v32 = vmul.f32 %v2643_v28, %v3021_v2  ;;  %v917_v39 = vpop.f32.mrb[11].mxu1 }
  0xfc   : > { %2119 = vst.msk [vmem:[%s3045_s5 + $0x11c] sm:$0xf] %vm2047_vm2, %v2508_v23  ;;  %2053 = vst.msk [vmem:[%s3045_s5 + $0x14] sm:$0xf] %vm2047_vm2, %v2442_v24  ;;  %v1353_v35 = vadd.f32 %v3026_v4, %v1218_v25  ;;  %v1287_v36 = vadd.f32 %v3026_v4, %v1152_v26  ;;  %v1219_v37 = vmul.f32 %v2707_v33, %v3021_v2  ;;  %v1417_v40 = vmax.f32 %v1289_v30, 0.0 }
  0xfd   : > { %v1153_v38 = vmul.f32 %v3021_v2, %v661_v34  ;;  %2117 = vst.msk [vmem:[%s3045_s5 + $0x114] sm:$0xf] %vm2047_vm2, %v2506_v29  ;;  %v1351_v41 = vadd.f32 %v3026_v4, %v1216_v31  ;;  %v1290_v42 = vadd.f32 %v3026_v4, %v1155_v32  ;;  %v1217_v43 = vmul.f32 %v3021_v2, %v917_v39 }
  0xfe   : > { %v1481_v44 = vmax.f32 %v1353_v35, 0.0  ;;  %v1415_v45 = vmax.f32 %v1287_v36, 0.0  ;;  %v1354_v46 = vadd.f32 %v3026_v4, %v1219_v37  ;;  %v2447_v48 = vpack.c.bf16 %v1417_v40, %v1417_v40 }
  0xff   : > { %v1288_v47 = vadd.f32 %v3026_v4, %v1153_v38  ;;  %v1479_v49 = vmax.f32 %v1351_v41, 0.0  ;;  %v1418_v50 = vmax.f32 %v1290_v42, 0.0  ;;  %v1352_v51 = vadd.f32 %v3026_v4, %v1217_v43  ;;  %v2646_v56 = vpop.f32.mrb[12].mxu0 }
 0x100   : > { %v2511_v52 = vpack.c.bf16 %v1481_v44, %v1481_v44  ;;  %v2445_v53 = vpack.c.bf16 %v1415_v45, %v1415_v45  ;;  %v1482_v54 = vmax.f32 %v1354_v46, 0.0  ;;  %2058 = vst.msk [vmem:[%s3045_s5 + $0x28] sm:$0xf] %vm2047_vm2, %v2447_v48  ;;  %v1158_v60 = vmul.f32 %v2646_v56, %v3021_v2  ;;  %v2710_v61 = vpop.f32.mrb[12].mxu1  ;;  %v674_v62 = vpop.f32.mrb[13].mxu0 }
 0x101   : > { %v1416_v55 = vmax.f32 %v1288_v47, 0.0  ;;  %v2509_v57 = vpack.c.bf16 %v1479_v49, %v1479_v49  ;;  %v2448_v58 = vpack.c.bf16 %v1418_v50, %v1418_v50  ;;  %v1480_v59 = vmax.f32 %v1352_v51, 0.0  ;;  %v930_v5 = vpop.f32.mrb[13].mxu1  ;;  %v2647_v6 = vpop.f32.mrb[14].mxu0 }
 0x102   : > { %2122 = vst.msk [vmem:[%s3045_s5 + $0x128] sm:$0xf] %vm2047_vm2, %v2511_v52  ;;  %2056 = vst.msk [vmem:[%s3045_s5 + $0x20] sm:$0xf] %vm2047_vm2, %v2445_v53  ;;  %v2512_v63 = vpack.c.bf16 %v1482_v54, %v1482_v54  ;;  %v1222_v1 = vmul.f32 %v2710_v61, %v3021_v2  ;;  %v1156_v3 = vmul.f32 %v3021_v2, %v674_v62  ;;  %v2711_v11 = vpop.f32.mrb[14].mxu1  ;;  %v677_v12 = vpop.f32.mrb[15].mxu0 }
 0x103   : > { %v2446_v0 = vpack.c.bf16 %v1416_v55, %v1416_v55  ;;  %2120 = vst.msk [vmem:[%s3045_s5 + $0x120] sm:$0xf] %vm2047_vm2, %v2509_v57  ;;  %2059 = vst.msk [vmem:[%s3045_s5 + $0x2c] sm:$0xf] %vm2047_vm2, %v2448_v58  ;;  %v2510_v7 = vpack.c.bf16 %v1480_v59, %v1480_v59  ;;  %v1293_v8 = vadd.f32 %v3026_v4, %v1158_v60  ;;  %v933_v17 = vpop.f32.mrb[15].mxu1 }
 0x104   : > { %v1220_v9 = vmul.f32 %v3021_v2, %v930_v5  ;;  %v1159_v10 = vmul.f32 %v2647_v6, %v3021_v2  ;;  %2123 = vst.msk [vmem:[%s3045_s5 + $0x12c] sm:$0xf] %vm2047_vm2, %v2512_v63  ;;  %v1357_v13 = vadd.f32 %v3026_v4, %v1222_v1  ;;  %v1291_v14 = vadd.f32 %v3026_v4, %v1156_v3 }
 0x105   : > { %2057 = vst.msk [vmem:[%s3045_s5 + $0x24] sm:$0xf] %vm2047_vm2, %v2446_v0  ;;  %v1223_v15 = vmul.f32 %v2711_v11, %v3021_v2  ;;  %v1157_v16 = vmul.f32 %v3021_v2, %v677_v12  ;;  %2121 = vst.msk [vmem:[%s3045_s5 + $0x124] sm:$0xf] %vm2047_vm2, %v2510_v7  ;;  %v1421_v18 = vmax.f32 %v1293_v8, 0.0  ;;  %v1221_v21 = vmul.f32 %v3021_v2, %v933_v17 }
 0x106   : > { %v1355_v19 = vadd.f32 %v3026_v4, %v1220_v9  ;;  %v1294_v20 = vadd.f32 %v3026_v4, %v1159_v10  ;;  %v1485_v22 = vmax.f32 %v1357_v13, 0.0  ;;  %v1419_v23 = vmax.f32 %v1291_v14, 0.0 }
 0x107   : > { %v1358_v24 = vadd.f32 %v3026_v4, %v1223_v15  ;;  %v1292_v25 = vadd.f32 %v3026_v4, %v1157_v16  ;;  %v2451_v26 = vpack.c.bf16 %v1421_v18, %v1421_v18  ;;  %v1356_v29 = vadd.f32 %v3026_v4, %v1221_v21  ;;  %v2650_v34 = vpop.f32.mrb[16].mxu0 }
 0x108   : > { %v1483_v27 = vmax.f32 %v1355_v19, 0.0  ;;  %v1422_v28 = vmax.f32 %v1294_v20, 0.0  ;;  %v2515_v30 = vpack.c.bf16 %v1485_v22, %v1485_v22  ;;  %v2449_v31 = vpack.c.bf16 %v1419_v23, %v1419_v23  ;;  %v2714_v39 = vpop.f32.mrb[16].mxu1  ;;  %v690_v40 = vpop.f32.mrb[17].mxu0 }
 0x109   : > { %v1486_v32 = vmax.f32 %v1358_v24, 0.0  ;;  %v1420_v33 = vmax.f32 %v1292_v25, 0.0  ;;  %2062 = vst.msk [vmem:[%s3045_s5 + $0x38] sm:$0xf] %vm2047_vm2, %v2451_v26  ;;  %v1484_v37 = vmax.f32 %v1356_v29, 0.0  ;;  %v1162_v38 = vmul.f32 %v2650_v34, %v3021_v2  ;;  %v946_v45 = vpop.f32.mrb[17].mxu1 }
 0x10a   : > { %v2513_v35 = vpack.c.bf16 %v1483_v27, %v1483_v27  ;;  %v2452_v36 = vpack.c.bf16 %v1422_v28, %v1422_v28  ;;  %2126 = vst.msk [vmem:[%s3045_s5 + $0x138] sm:$0xf] %vm2047_vm2, %v2515_v30  ;;  %2060 = vst.msk [vmem:[%s3045_s5 + $0x30] sm:$0xf] %vm2047_vm2, %v2449_v31  ;;  %v1226_v43 = vmul.f32 %v2714_v39, %v3021_v2  ;;  %v2651_v46 = vpop.f32.mrb[18].mxu0  ;;  %v2715_v51 = vpop.f32.mrb[18].mxu1 }
 0x10b   : > { %v2516_v41 = vpack.c.bf16 %v1486_v32, %v1486_v32  ;;  %v2450_v42 = vpack.c.bf16 %v1420_v33, %v1420_v33  ;;  %v1160_v44 = vmul.f32 %v3021_v2, %v690_v40  ;;  %v2514_v47 = vpack.c.bf16 %v1484_v37, %v1484_v37  ;;  %v693_v52 = vpop.f32.mrb[19].mxu0  ;;  %v949_v57 = vpop.f32.mrb[19].mxu1 }
 0x10c   : > { %2124 = vst.msk [vmem:[%s3045_s5 + $0x130] sm:$0xf] %vm2047_vm2, %v2513_v35  ;;  %2063 = vst.msk [vmem:[%s3045_s5 + $0x3c] sm:$0xf] %vm2047_vm2, %v2452_v36  ;;  %v1297_v48 = vadd.f32 %v3026_v4, %v1162_v38  ;;  %v1224_v49 = vmul.f32 %v3021_v2, %v946_v45  ;;  %v1163_v50 = vmul.f32 %v2651_v46, %v3021_v2 }
 0x10d   : > { %2127 = vst.msk [vmem:[%s3045_s5 + $0x13c] sm:$0xf] %vm2047_vm2, %v2516_v41  ;;  %2061 = vst.msk [vmem:[%s3045_s5 + $0x34] sm:$0xf] %vm2047_vm2, %v2450_v42  ;;  %v1361_v53 = vadd.f32 %v3026_v4, %v1226_v43  ;;  %v1295_v54 = vadd.f32 %v3026_v4, %v1160_v44  ;;  %v1227_v55 = vmul.f32 %v2715_v51, %v3021_v2 }
 0x10e   : > { %v1161_v56 = vmul.f32 %v3021_v2, %v693_v52  ;;  %2125 = vst.msk [vmem:[%s3045_s5 + $0x134] sm:$0xf] %vm2047_vm2, %v2514_v47  ;;  %v1425_v58 = vmax.f32 %v1297_v48, 0.0  ;;  %v1359_v59 = vadd.f32 %v3026_v4, %v1224_v49  ;;  %v1298_v60 = vadd.f32 %v3026_v4, %v1163_v50 }
 0x10f   : > { %v1225_v61 = vmul.f32 %v3021_v2, %v949_v57  ;;  %v1489_v62 = vmax.f32 %v1361_v53, 0.0  ;;  %v1423_v63 = vmax.f32 %v1295_v54, 0.0  ;;  %v1362_v0 = vadd.f32 %v3026_v4, %v1227_v55  ;;  %v2654_v12 = vpop.f32.mrb[20].mxu0 }
 0x110   : > { %v1296_v1 = vadd.f32 %v3026_v4, %v1161_v56  ;;  %v2455_v3 = vpack.c.bf16 %v1425_v58, %v1425_v58  ;;  %v1487_v5 = vmax.f32 %v1359_v59, 0.0  ;;  %v1426_v6 = vmax.f32 %v1298_v60, 0.0  ;;  %v2718_v17 = vpop.f32.mrb[20].mxu1  ;;  %v706_v18 = vpop.f32.mrb[21].mxu0 }
 0x111   : > { %v1360_v7 = vadd.f32 %v3026_v4, %v1225_v61  ;;  %v2519_v8 = vpack.c.bf16 %v1489_v62, %v1489_v62  ;;  %v2453_v9 = vpack.c.bf16 %v1423_v63, %v1423_v63  ;;  %v1490_v10 = vmax.f32 %v1362_v0, 0.0  ;;  %v962_v23 = vpop.f32.mrb[21].mxu1  ;;  %v2655_v24 = vpop.f32.mrb[22].mxu0 }
 0x112   : > { %v1424_v11 = vmax.f32 %v1296_v1, 0.0  ;;  %2066 = vst.msk [vmem:[%s3045_s5 + $0x48] sm:$0xf] %vm2047_vm2, %v2455_v3  ;;  %v2517_v13 = vpack.c.bf16 %v1487_v5, %v1487_v5  ;;  %v2456_v14 = vpack.c.bf16 %v1426_v6, %v1426_v6  ;;  %v1166_v16 = vmul.f32 %v2654_v12, %v3021_v2  ;;  %v2719_v29 = vpop.f32.mrb[22].mxu1  ;;  %v709_v30 = vpop.f32.mrb[23].mxu0 }
 0x113   : > { %v1488_v15 = vmax.f32 %v1360_v7, 0.0  ;;  %2130 = vst.msk [vmem:[%s3045_s5 + $0x148] sm:$0xf] %vm2047_vm2, %v2519_v8  ;;  %2064 = vst.msk [vmem:[%s3045_s5 + $0x40] sm:$0xf] %vm2047_vm2, %v2453_v9  ;;  %v2520_v19 = vpack.c.bf16 %v1490_v10, %v1490_v10  ;;  %v1230_v21 = vmul.f32 %v2718_v17, %v3021_v2  ;;  %v1164_v22 = vmul.f32 %v3021_v2, %v706_v18  ;;  %v965_v35 = vpop.f32.mrb[23].mxu1 }
 0x114   : > { %v2454_v20 = vpack.c.bf16 %v1424_v11, %v1424_v11  ;;  %2128 = vst.msk [vmem:[%s3045_s5 + $0x140] sm:$0xf] %vm2047_vm2, %v2517_v13  ;;  %2067 = vst.msk [vmem:[%s3045_s5 + $0x4c] sm:$0xf] %vm2047_vm2, %v2456_v14  ;;  %v1301_v26 = vadd.f32 %v3026_v4, %v1166_v16  ;;  %v1228_v27 = vmul.f32 %v3021_v2, %v962_v23 }
 0x115   : > { %v2518_v25 = vpack.c.bf16 %v1488_v15, %v1488_v15  ;;  %v1167_v28 = vmul.f32 %v2655_v24, %v3021_v2  ;;  %2131 = vst.msk [vmem:[%s3045_s5 + $0x14c] sm:$0xf] %vm2047_vm2, %v2520_v19  ;;  %v1365_v31 = vadd.f32 %v3026_v4, %v1230_v21  ;;  %v1299_v32 = vadd.f32 %v3026_v4, %v1164_v22 }
 0x116   : > { %2065 = vst.msk [vmem:[%s3045_s5 + $0x44] sm:$0xf] %vm2047_vm2, %v2454_v20  ;;  %v1231_v33 = vmul.f32 %v2719_v29, %v3021_v2  ;;  %v1165_v34 = vmul.f32 %v3021_v2, %v709_v30  ;;  %v1429_v36 = vmax.f32 %v1301_v26, 0.0  ;;  %v1363_v37 = vadd.f32 %v3026_v4, %v1228_v27 }
 0x117   : > { %2129 = vst.msk [vmem:[%s3045_s5 + $0x144] sm:$0xf] %vm2047_vm2, %v2518_v25  ;;  %v1302_v38 = vadd.f32 %v3026_v4, %v1167_v28  ;;  %v1229_v39 = vmul.f32 %v3021_v2, %v965_v35  ;;  %v1493_v40 = vmax.f32 %v1365_v31, 0.0  ;;  %v1427_v41 = vmax.f32 %v1299_v32, 0.0  ;;  %v2658_v52 = vpop.f32.mrb[24].mxu0 }
 0x118   : > { %v1366_v42 = vadd.f32 %v3026_v4, %v1231_v33  ;;  %v1300_v43 = vadd.f32 %v3026_v4, %v1165_v34  ;;  %v2459_v44 = vpack.c.bf16 %v1429_v36, %v1429_v36  ;;  %v1491_v45 = vmax.f32 %v1363_v37, 0.0  ;;  %v2722_v57 = vpop.f32.mrb[24].mxu1  ;;  %v722_v58 = vpop.f32.mrb[25].mxu0 }
 0x119   : > { %v1430_v46 = vmax.f32 %v1302_v38, 0.0  ;;  %v1364_v47 = vadd.f32 %v3026_v4, %v1229_v39  ;;  %v2523_v48 = vpack.c.bf16 %v1493_v40, %v1493_v40  ;;  %v2457_v49 = vpack.c.bf16 %v1427_v41, %v1427_v41  ;;  %v978_v63 = vpop.f32.mrb[25].mxu1  ;;  %v2659_v0 = vpop.f32.mrb[26].mxu0 }
 0x11a   : > { %v1494_v50 = vmax.f32 %v1366_v42, 0.0  ;;  %v1428_v51 = vmax.f32 %v1300_v43, 0.0  ;;  %2070 = vst.msk [vmem:[%s3045_s5 + $0x58] sm:$0xf] %vm2047_vm2, %v2459_v44  ;;  %v2521_v53 = vpack.c.bf16 %v1491_v45, %v1491_v45  ;;  %v1170_v56 = vmul.f32 %v2658_v52, %v3021_v2  ;;  %v2723_v7 = vpop.f32.mrb[26].mxu1  ;;  %v725_v8 = vpop.f32.mrb[27].mxu0 }
 0x11b   : > { %v2460_v54 = vpack.c.bf16 %v1430_v46, %v1430_v46  ;;  %v1492_v55 = vmax.f32 %v1364_v47, 0.0  ;;  %2134 = vst.msk [vmem:[%s3045_s5 + $0x158] sm:$0xf] %vm2047_vm2, %v2523_v48  ;;  %2068 = vst.msk [vmem:[%s3045_s5 + $0x50] sm:$0xf] %vm2047_vm2, %v2457_v49  ;;  %v1234_v61 = vmul.f32 %v2722_v57, %v3021_v2  ;;  %v1168_v62 = vmul.f32 %v3021_v2, %v722_v58  ;;  %v981_v13 = vpop.f32.mrb[27].mxu1 }
 0x11c   : > { %v2524_v59 = vpack.c.bf16 %v1494_v50, %v1494_v50  ;;  %v2458_v60 = vpack.c.bf16 %v1428_v51, %v1428_v51  ;;  %2132 = vst.msk [vmem:[%s3045_s5 + $0x150] sm:$0xf] %vm2047_vm2, %v2521_v53  ;;  %v1305_v3 = vadd.f32 %v3026_v4, %v1170_v56  ;;  %v1232_v5 = vmul.f32 %v3021_v2, %v978_v63 }
 0x11d   : > { %2071 = vst.msk [vmem:[%s3045_s5 + $0x5c] sm:$0xf] %vm2047_vm2, %v2460_v54  ;;  %v2522_v1 = vpack.c.bf16 %v1492_v55, %v1492_v55  ;;  %v1171_v6 = vmul.f32 %v2659_v0, %v3021_v2  ;;  %v1369_v9 = vadd.f32 %v3026_v4, %v1234_v61  ;;  %v1303_v10 = vadd.f32 %v3026_v4, %v1168_v62 }
 0x11e   : > { %2135 = vst.msk [vmem:[%s3045_s5 + $0x15c] sm:$0xf] %vm2047_vm2, %v2524_v59  ;;  %2069 = vst.msk [vmem:[%s3045_s5 + $0x54] sm:$0xf] %vm2047_vm2, %v2458_v60  ;;  %v1235_v11 = vmul.f32 %v2723_v7, %v3021_v2  ;;  %v1169_v12 = vmul.f32 %v3021_v2, %v725_v8  ;;  %v1433_v14 = vmax.f32 %v1305_v3, 0.0  ;;  %v1367_v15 = vadd.f32 %v3026_v4, %v1232_v5 }
 0x11f   : > { %2133 = vst.msk [vmem:[%s3045_s5 + $0x154] sm:$0xf] %vm2047_vm2, %v2522_v1  ;;  %v1306_v16 = vadd.f32 %v3026_v4, %v1171_v6  ;;  %v1233_v17 = vmul.f32 %v3021_v2, %v981_v13  ;;  %v1497_v18 = vmax.f32 %v1369_v9, 0.0  ;;  %v1431_v19 = vmax.f32 %v1303_v10, 0.0  ;;  %v2662_v30 = vpop.f32.mrb[28].mxu0 }
 0x120   : > { %v1370_v20 = vadd.f32 %v3026_v4, %v1235_v11  ;;  %v1304_v21 = vadd.f32 %v3026_v4, %v1169_v12  ;;  %v2463_v22 = vpack.c.bf16 %v1433_v14, %v1433_v14  ;;  %v1495_v23 = vmax.f32 %v1367_v15, 0.0  ;;  %v2726_v35 = vpop.f32.mrb[28].mxu1  ;;  %v738_v36 = vpop.f32.mrb[29].mxu0 }
 0x121   : > { %v1434_v24 = vmax.f32 %v1306_v16, 0.0  ;;  %v1368_v25 = vadd.f32 %v3026_v4, %v1233_v17  ;;  %v2527_v26 = vpack.c.bf16 %v1497_v18, %v1497_v18  ;;  %v2461_v27 = vpack.c.bf16 %v1431_v19, %v1431_v19  ;;  %v994_v41 = vpop.f32.mrb[29].mxu1  ;;  %v2663_v42 = vpop.f32.mrb[30].mxu0 }
 0x122   : > { %v1498_v28 = vmax.f32 %v1370_v20, 0.0  ;;  %v1432_v29 = vmax.f32 %v1304_v21, 0.0  ;;  %2074 = vst.msk [vmem:[%s3045_s5 + $0x68] sm:$0xf] %vm2047_vm2, %v2463_v22  ;;  %v2525_v31 = vpack.c.bf16 %v1495_v23, %v1495_v23  ;;  %v1174_v34 = vmul.f32 %v2662_v30, %v3021_v2  ;;  %v2727_v47 = vpop.f32.mrb[30].mxu1  ;;  %v741_v48 = vpop.f32.mrb[31].mxu0 }
 0x123   : > { %v2464_v32 = vpack.c.bf16 %v1434_v24, %v1434_v24  ;;  %v1496_v33 = vmax.f32 %v1368_v25, 0.0  ;;  %2138 = vst.msk [vmem:[%s3045_s5 + $0x168] sm:$0xf] %vm2047_vm2, %v2527_v26  ;;  %2072 = vst.msk [vmem:[%s3045_s5 + $0x60] sm:$0xf] %vm2047_vm2, %v2461_v27  ;;  %v1238_v39 = vmul.f32 %v2726_v35, %v3021_v2  ;;  %v1172_v40 = vmul.f32 %v3021_v2, %v738_v36  ;;  %v997_v53 = vpop.f32.mrb[31].mxu1 }
 0x124   : > { %v2528_v37 = vpack.c.bf16 %v1498_v28, %v1498_v28  ;;  %v2462_v38 = vpack.c.bf16 %v1432_v29, %v1432_v29  ;;  %2136 = vst.msk [vmem:[%s3045_s5 + $0x160] sm:$0xf] %vm2047_vm2, %v2525_v31  ;;  %v1309_v44 = vadd.f32 %v3026_v4, %v1174_v34  ;;  %v1236_v45 = vmul.f32 %v3021_v2, %v994_v41 }
 0x125   : > { %2075 = vst.msk [vmem:[%s3045_s5 + $0x6c] sm:$0xf] %vm2047_vm2, %v2464_v32  ;;  %v2526_v43 = vpack.c.bf16 %v1496_v33, %v1496_v33  ;;  %v1175_v46 = vmul.f32 %v2663_v42, %v3021_v2  ;;  %v1373_v49 = vadd.f32 %v3026_v4, %v1238_v39  ;;  %v1307_v50 = vadd.f32 %v3026_v4, %v1172_v40 }
 0x126   : > { %2139 = vst.msk [vmem:[%s3045_s5 + $0x16c] sm:$0xf] %vm2047_vm2, %v2528_v37  ;;  %2073 = vst.msk [vmem:[%s3045_s5 + $0x64] sm:$0xf] %vm2047_vm2, %v2462_v38  ;;  %v1239_v51 = vmul.f32 %v2727_v47, %v3021_v2  ;;  %v1173_v52 = vmul.f32 %v3021_v2, %v741_v48  ;;  %v1437_v54 = vmax.f32 %v1309_v44, 0.0  ;;  %v1371_v55 = vadd.f32 %v3026_v4, %v1236_v45 }
 0x127   : > { %2137 = vst.msk [vmem:[%s3045_s5 + $0x164] sm:$0xf] %vm2047_vm2, %v2526_v43  ;;  %v1310_v56 = vadd.f32 %v3026_v4, %v1175_v46  ;;  %v1237_v57 = vmul.f32 %v3021_v2, %v997_v53  ;;  %v1501_v58 = vmax.f32 %v1373_v49, 0.0  ;;  %v1435_v59 = vmax.f32 %v1307_v50, 0.0  ;;  %v2666_v8 = vpop.f32.mrb[32].mxu0 }
 0x128   : > { %v1374_v60 = vadd.f32 %v3026_v4, %v1239_v51  ;;  %v1308_v61 = vadd.f32 %v3026_v4, %v1173_v52  ;;  %v2467_v62 = vpack.c.bf16 %v1437_v54, %v1437_v54  ;;  %v1499_v63 = vmax.f32 %v1371_v55, 0.0  ;;  %v2730_v13 = vpop.f32.mrb[32].mxu1  ;;  %v754_v14 = vpop.f32.mrb[33].mxu0 }
 0x129   : > { %v1438_v0 = vmax.f32 %v1310_v56, 0.0  ;;  %v1372_v1 = vadd.f32 %v3026_v4, %v1237_v57  ;;  %v2531_v3 = vpack.c.bf16 %v1501_v58, %v1501_v58  ;;  %v2465_v5 = vpack.c.bf16 %v1435_v59, %v1435_v59  ;;  %v1010_v19 = vpop.f32.mrb[33].mxu1  ;;  %v2667_v20 = vpop.f32.mrb[34].mxu0 }
 0x12a   : > { %v1502_v6 = vmax.f32 %v1374_v60, 0.0  ;;  %v1436_v7 = vmax.f32 %v1308_v61, 0.0  ;;  %2078 = vst.msk [vmem:[%s3045_s5 + $0x78] sm:$0xf] %vm2047_vm2, %v2467_v62  ;;  %v2529_v9 = vpack.c.bf16 %v1499_v63, %v1499_v63  ;;  %v1178_v12 = vmul.f32 %v2666_v8, %v3021_v2  ;;  %v2731_v25 = vpop.f32.mrb[34].mxu1  ;;  %v757_v26 = vpop.f32.mrb[35].mxu0 }
 0x12b   : > { %v2468_v10 = vpack.c.bf16 %v1438_v0, %v1438_v0  ;;  %v1500_v11 = vmax.f32 %v1372_v1, 0.0  ;;  %2142 = vst.msk [vmem:[%s3045_s5 + $0x178] sm:$0xf] %vm2047_vm2, %v2531_v3  ;;  %2076 = vst.msk [vmem:[%s3045_s5 + $0x70] sm:$0xf] %vm2047_vm2, %v2465_v5  ;;  %v1242_v17 = vmul.f32 %v2730_v13, %v3021_v2  ;;  %v1176_v18 = vmul.f32 %v3021_v2, %v754_v14  ;;  %v1013_v31 = vpop.f32.mrb[35].mxu1 }
 0x12c   : > { %v2532_v15 = vpack.c.bf16 %v1502_v6, %v1502_v6  ;;  %v2466_v16 = vpack.c.bf16 %v1436_v7, %v1436_v7  ;;  %2140 = vst.msk [vmem:[%s3045_s5 + $0x170] sm:$0xf] %vm2047_vm2, %v2529_v9  ;;  %v1313_v22 = vadd.f32 %v3026_v4, %v1178_v12  ;;  %v1240_v23 = vmul.f32 %v3021_v2, %v1010_v19 }
 0x12d   : > { %2079 = vst.msk [vmem:[%s3045_s5 + $0x7c] sm:$0xf] %vm2047_vm2, %v2468_v10  ;;  %v2530_v21 = vpack.c.bf16 %v1500_v11, %v1500_v11  ;;  %v1179_v24 = vmul.f32 %v2667_v20, %v3021_v2  ;;  %v1377_v27 = vadd.f32 %v3026_v4, %v1242_v17  ;;  %v1311_v28 = vadd.f32 %v3026_v4, %v1176_v18 }
 0x12e   : > { %2143 = vst.msk [vmem:[%s3045_s5 + $0x17c] sm:$0xf] %vm2047_vm2, %v2532_v15  ;;  %2077 = vst.msk [vmem:[%s3045_s5 + $0x74] sm:$0xf] %vm2047_vm2, %v2466_v16  ;;  %v1243_v29 = vmul.f32 %v2731_v25, %v3021_v2  ;;  %v1177_v30 = vmul.f32 %v3021_v2, %v757_v26  ;;  %v1441_v32 = vmax.f32 %v1313_v22, 0.0  ;;  %v1375_v33 = vadd.f32 %v3026_v4, %v1240_v23 }
 0x12f   : > { %2141 = vst.msk [vmem:[%s3045_s5 + $0x174] sm:$0xf] %vm2047_vm2, %v2530_v21  ;;  %v1314_v34 = vadd.f32 %v3026_v4, %v1179_v24  ;;  %v1241_v35 = vmul.f32 %v3021_v2, %v1013_v31  ;;  %v1505_v36 = vmax.f32 %v1377_v27, 0.0  ;;  %v1439_v37 = vmax.f32 %v1311_v28, 0.0  ;;  %v2670_v48 = vpop.f32.mrb[36].mxu0 }
 0x130   : > { %v1378_v38 = vadd.f32 %v3026_v4, %v1243_v29  ;;  %v1312_v39 = vadd.f32 %v3026_v4, %v1177_v30  ;;  %v2471_v40 = vpack.c.bf16 %v1441_v32, %v1441_v32  ;;  %v1503_v41 = vmax.f32 %v1375_v33, 0.0  ;;  %v2734_v53 = vpop.f32.mrb[36].mxu1  ;;  %v770_v54 = vpop.f32.mrb[37].mxu0 }
 0x131   : > { %v1442_v42 = vmax.f32 %v1314_v34, 0.0  ;;  %v1376_v43 = vadd.f32 %v3026_v4, %v1241_v35  ;;  %v2535_v44 = vpack.c.bf16 %v1505_v36, %v1505_v36  ;;  %v2469_v45 = vpack.c.bf16 %v1439_v37, %v1439_v37  ;;  %v1026_v59 = vpop.f32.mrb[37].mxu1  ;;  %v2671_v60 = vpop.f32.mrb[38].mxu0 }
 0x132   : > { %v1506_v46 = vmax.f32 %v1378_v38, 0.0  ;;  %v1440_v47 = vmax.f32 %v1312_v39, 0.0  ;;  %2082 = vst.msk [vmem:[%s3045_s5 + $0x88] sm:$0xf] %vm2047_vm2, %v2471_v40  ;;  %v2533_v49 = vpack.c.bf16 %v1503_v41, %v1503_v41  ;;  %v1182_v52 = vmul.f32 %v2670_v48, %v3021_v2  ;;  %v2735_v1 = vpop.f32.mrb[38].mxu1  ;;  %v773_v3 = vpop.f32.mrb[39].mxu0 }
 0x133   : > { %v2472_v50 = vpack.c.bf16 %v1442_v42, %v1442_v42  ;;  %v1504_v51 = vmax.f32 %v1376_v43, 0.0  ;;  %2146 = vst.msk [vmem:[%s3045_s5 + $0x188] sm:$0xf] %vm2047_vm2, %v2535_v44  ;;  %2080 = vst.msk [vmem:[%s3045_s5 + $0x80] sm:$0xf] %vm2047_vm2, %v2469_v45  ;;  %v1246_v57 = vmul.f32 %v2734_v53, %v3021_v2  ;;  %v1180_v58 = vmul.f32 %v3021_v2, %v770_v54  ;;  %v1029_v9 = vpop.f32.mrb[39].mxu1 }
 0x134   : > { %v2536_v55 = vpack.c.bf16 %v1506_v46, %v1506_v46  ;;  %v2470_v56 = vpack.c.bf16 %v1440_v47, %v1440_v47  ;;  %2144 = vst.msk [vmem:[%s3045_s5 + $0x180] sm:$0xf] %vm2047_vm2, %v2533_v49  ;;  %v1317_v62 = vadd.f32 %v3026_v4, %v1182_v52  ;;  %v1244_v63 = vmul.f32 %v3021_v2, %v1026_v59 }
 0x135   : > { %2083 = vst.msk [vmem:[%s3045_s5 + $0x8c] sm:$0xf] %vm2047_vm2, %v2472_v50  ;;  %v2534_v61 = vpack.c.bf16 %v1504_v51, %v1504_v51  ;;  %v1183_v0 = vmul.f32 %v2671_v60, %v3021_v2  ;;  %v1381_v5 = vadd.f32 %v3026_v4, %v1246_v57  ;;  %v1315_v6 = vadd.f32 %v3026_v4, %v1180_v58 }
 0x136   : > { %2147 = vst.msk [vmem:[%s3045_s5 + $0x18c] sm:$0xf] %vm2047_vm2, %v2536_v55  ;;  %2081 = vst.msk [vmem:[%s3045_s5 + $0x84] sm:$0xf] %vm2047_vm2, %v2470_v56  ;;  %v1247_v7 = vmul.f32 %v2735_v1, %v3021_v2  ;;  %v1181_v8 = vmul.f32 %v3021_v2, %v773_v3  ;;  %v1445_v10 = vmax.f32 %v1317_v62, 0.0  ;;  %v1379_v11 = vadd.f32 %v3026_v4, %v1244_v63 }
 0x137   : > { %2145 = vst.msk [vmem:[%s3045_s5 + $0x184] sm:$0xf] %vm2047_vm2, %v2534_v61  ;;  %v1318_v12 = vadd.f32 %v3026_v4, %v1183_v0  ;;  %v1245_v13 = vmul.f32 %v3021_v2, %v1029_v9  ;;  %v1509_v14 = vmax.f32 %v1381_v5, 0.0  ;;  %v1443_v15 = vmax.f32 %v1315_v6, 0.0  ;;  %v2674_v26 = vpop.f32.mrb[40].mxu0 }
 0x138   : > { %v1382_v16 = vadd.f32 %v3026_v4, %v1247_v7  ;;  %v1316_v17 = vadd.f32 %v3026_v4, %v1181_v8  ;;  %v2475_v18 = vpack.c.bf16 %v1445_v10, %v1445_v10  ;;  %v1507_v19 = vmax.f32 %v1379_v11, 0.0  ;;  %v2738_v31 = vpop.f32.mrb[40].mxu1  ;;  %v786_v32 = vpop.f32.mrb[41].mxu0  ;;  %v3372_v61 = vld [vmem:[%s3562_s3] ss:$0 sm:$0xff] }
 0x139   : > { %v1446_v20 = vmax.f32 %v1318_v12, 0.0  ;;  %v1380_v21 = vadd.f32 %v3026_v4, %v1245_v13  ;;  %v2539_v22 = vpack.c.bf16 %v1509_v14, %v1509_v14  ;;  %v2473_v23 = vpack.c.bf16 %v1443_v15, %v1443_v15  ;;  %v1042_v37 = vpop.f32.mrb[41].mxu1  ;;  %v2675_v38 = vpop.f32.mrb[42].mxu0  ;;  %v3380_v7 = vld [vmem:[%s3561_s2] ss:$0 sm:$0xff] }
 0x13a   : > { %v1510_v24 = vmax.f32 %v1382_v16, 0.0  ;;  %v1444_v25 = vmax.f32 %v1316_v17, 0.0  ;;  %2086 = vst.msk [vmem:[%s3045_s5 + $0x98] sm:$0xf] %vm2047_vm2, %v2475_v18  ;;  %v2537_v27 = vpack.c.bf16 %v1507_v19, %v1507_v19  ;;  %v1186_v30 = vmul.f32 %v2674_v26, %v3021_v2  ;;  %v2739_v43 = vpop.f32.mrb[42].mxu1  ;;  %v789_v44 = vpop.f32.mrb[43].mxu0 }
 0x13b   : > { %v2476_v28 = vpack.c.bf16 %v1446_v20, %v1446_v20  ;;  %v1508_v29 = vmax.f32 %v1380_v21, 0.0  ;;  %2150 = vst.msk [vmem:[%s3045_s5 + $0x198] sm:$0xf] %vm2047_vm2, %v2539_v22  ;;  %2084 = vst.msk [vmem:[%s3045_s5 + $0x90] sm:$0xf] %vm2047_vm2, %v2473_v23  ;;  %v1250_v35 = vmul.f32 %v2738_v31, %v3021_v2  ;;  %v1184_v36 = vmul.f32 %v3021_v2, %v786_v32  ;;  %v1045_v49 = vpop.f32.mrb[43].mxu1 }
 0x13c   : > { %v2540_v33 = vpack.c.bf16 %v1510_v24, %v1510_v24  ;;  %v2474_v34 = vpack.c.bf16 %v1444_v25, %v1444_v25  ;;  %2148 = vst.msk [vmem:[%s3045_s5 + $0x190] sm:$0xf] %vm2047_vm2, %v2537_v27  ;;  %v1321_v40 = vadd.f32 %v3026_v4, %v1186_v30  ;;  %v1248_v41 = vmul.f32 %v3021_v2, %v1042_v37 }
 0x13d   : > { %2087 = vst.msk [vmem:[%s3045_s5 + $0x9c] sm:$0xf] %vm2047_vm2, %v2476_v28  ;;  %v2538_v39 = vpack.c.bf16 %v1508_v29, %v1508_v29  ;;  %v1187_v42 = vmul.f32 %v2675_v38, %v3021_v2  ;;  %v1385_v45 = vadd.f32 %v3026_v4, %v1250_v35  ;;  %v1319_v46 = vadd.f32 %v3026_v4, %v1184_v36 }
 0x13e   : > { %2151 = vst.msk [vmem:[%s3045_s5 + $0x19c] sm:$0xf] %vm2047_vm2, %v2540_v33  ;;  %2085 = vst.msk [vmem:[%s3045_s5 + $0x94] sm:$0xf] %vm2047_vm2, %v2474_v34  ;;  %v1251_v47 = vmul.f32 %v2739_v43, %v3021_v2  ;;  %v1185_v48 = vmul.f32 %v3021_v2, %v789_v44  ;;  %v1449_v50 = vmax.f32 %v1321_v40, 0.0  ;;  %v1383_v51 = vadd.f32 %v3026_v4, %v1248_v41 }
 0x13f   : > { %2149 = vst.msk [vmem:[%s3045_s5 + $0x194] sm:$0xf] %vm2047_vm2, %v2538_v39  ;;  %v1322_v52 = vadd.f32 %v3026_v4, %v1187_v42  ;;  %v1249_v53 = vmul.f32 %v3021_v2, %v1045_v49  ;;  %v1513_v54 = vmax.f32 %v1385_v45, 0.0  ;;  %v1447_v55 = vmax.f32 %v1319_v46, 0.0  ;;  %v2678_v3 = vpop.f32.mrb[44].mxu0 }
 0x140   : > { %v1386_v56 = vadd.f32 %v3026_v4, %v1251_v47  ;;  %v1320_v57 = vadd.f32 %v3026_v4, %v1185_v48  ;;  %v2479_v58 = vpack.c.bf16 %v1449_v50, %v1449_v50  ;;  %v1511_v59 = vmax.f32 %v1383_v51, 0.0  ;;  %v2742_v9 = vpop.f32.mrb[44].mxu1  ;;  %v802_v10 = vpop.f32.mrb[45].mxu0 }
 0x141   : > { %v1450_v60 = vmax.f32 %v1322_v52, 0.0  ;;  %v1384_v62 = vadd.f32 %v3372_v61, %v1249_v53  ;;  %v2543_v63 = vpack.c.bf16 %v1513_v54, %v1513_v54  ;;  %v2477_v2 = vpack.c.bf16 %v1447_v55, %v1447_v55  ;;  %v1058_v15 = vpop.f32.mrb[45].mxu1  ;;  %v2679_v16 = vpop.f32.mrb[46].mxu0 }
 0x142   : > { %v1514_v0 = vmax.f32 %v1386_v56, 0.0  ;;  %v1448_v1 = vmax.f32 %v1320_v57, 0.0  ;;  %2090 = vst.msk [vmem:[%s3045_s5 + $0xa8] sm:$0xf] %vm2047_vm2, %v2479_v58  ;;  %v2541_v4 = vpack.c.bf16 %v1511_v59, %v1511_v59  ;;  %v1190_v8 = vmul.f32 %v3380_v7, %v2678_v3  ;;  %v2743_v21 = vpop.f32.mrb[46].mxu1  ;;  %v805_v22 = vpop.f32.mrb[47].mxu0 }
 0x143   : > { %v2480_v5 = vpack.c.bf16 %v1450_v60, %v1450_v60  ;;  %v1512_v6 = vmax.f32 %v1384_v62, 0.0  ;;  %2154 = vst.msk [vmem:[%s3045_s5 + $0x1a8] sm:$0xf] %vm2047_vm2, %v2543_v63  ;;  %2088 = vst.msk [vmem:[%s3045_s5 + $0xa0] sm:$0xf] %vm2047_vm2, %v2477_v2  ;;  %v1254_v13 = vmul.f32 %v3380_v7, %v2742_v9  ;;  %v1188_v14 = vmul.f32 %v3380_v7, %v802_v10  ;;  %v1061_v27 = vpop.f32.mrb[47].mxu1 }
 0x144   : > { %v2544_v11 = vpack.c.bf16 %v1514_v0, %v1514_v0  ;;  %v2478_v12 = vpack.c.bf16 %v1448_v1, %v1448_v1  ;;  %2152 = vst.msk [vmem:[%s3045_s5 + $0x1a0] sm:$0xf] %vm2047_vm2, %v2541_v4  ;;  %v1325_v18 = vadd.f32 %v3372_v61, %v1190_v8  ;;  %v1252_v19 = vmul.f32 %v3380_v7, %v1058_v15 }
 0x145   : > { %2091 = vst.msk [vmem:[%s3045_s5 + $0xac] sm:$0xf] %vm2047_vm2, %v2480_v5  ;;  %v2542_v17 = vpack.c.bf16 %v1512_v6, %v1512_v6  ;;  %v1191_v20 = vmul.f32 %v3380_v7, %v2679_v16  ;;  %v1389_v23 = vadd.f32 %v3372_v61, %v1254_v13  ;;  %v1323_v24 = vadd.f32 %v3372_v61, %v1188_v14 }
 0x146   : > { %2155 = vst.msk [vmem:[%s3045_s5 + $0x1ac] sm:$0xf] %vm2047_vm2, %v2544_v11  ;;  %2089 = vst.msk [vmem:[%s3045_s5 + $0xa4] sm:$0xf] %vm2047_vm2, %v2478_v12  ;;  %v1255_v25 = vmul.f32 %v3380_v7, %v2743_v21  ;;  %v1189_v26 = vmul.f32 %v3380_v7, %v805_v22  ;;  %v1453_v28 = vmax.f32 %v1325_v18, 0.0  ;;  %v1387_v29 = vadd.f32 %v3372_v61, %v1252_v19 }
 0x147   : > { %2153 = vst.msk [vmem:[%s3045_s5 + $0x1a4] sm:$0xf] %vm2047_vm2, %v2542_v17  ;;  %v1326_v30 = vadd.f32 %v3372_v61, %v1191_v20  ;;  %v1253_v31 = vmul.f32 %v3380_v7, %v1061_v27  ;;  %v1517_v32 = vmax.f32 %v1389_v23, 0.0  ;;  %v1451_v33 = vmax.f32 %v1323_v24, 0.0  ;;  %v2682_v44 = vpop.f32.mrb[48].mxu0 }
 0x148   : > { %v1390_v34 = vadd.f32 %v3372_v61, %v1255_v25  ;;  %v1324_v35 = vadd.f32 %v3372_v61, %v1189_v26  ;;  %v2483_v36 = vpack.c.bf16 %v1453_v28, %v1453_v28  ;;  %v1515_v37 = vmax.f32 %v1387_v29, 0.0  ;;  %v2746_v49 = vpop.f32.mrb[48].mxu1  ;;  %v818_v50 = vpop.f32.mrb[49].mxu0 }
 0x149   : > { %v1454_v38 = vmax.f32 %v1326_v30, 0.0  ;;  %v1388_v39 = vadd.f32 %v3372_v61, %v1253_v31  ;;  %v2547_v40 = vpack.c.bf16 %v1517_v32, %v1517_v32  ;;  %v2481_v41 = vpack.c.bf16 %v1451_v33, %v1451_v33  ;;  %v1074_v55 = vpop.f32.mrb[49].mxu1  ;;  %v2683_v56 = vpop.f32.mrb[50].mxu0 }
 0x14a   : > { %v1518_v42 = vmax.f32 %v1390_v34, 0.0  ;;  %v1452_v43 = vmax.f32 %v1324_v35, 0.0  ;;  %2094 = vst.msk [vmem:[%s3045_s5 + $0xb8] sm:$0xf] %vm2047_vm2, %v2483_v36  ;;  %v2545_v45 = vpack.c.bf16 %v1515_v37, %v1515_v37  ;;  %v1194_v48 = vmul.f32 %v3380_v7, %v2682_v44  ;;  %v2747_v62 = vpop.f32.mrb[50].mxu1  ;;  %v821_v63 = vpop.f32.mrb[51].mxu0 }
 0x14b   : > { %v2484_v46 = vpack.c.bf16 %v1454_v38, %v1454_v38  ;;  %v1516_v47 = vmax.f32 %v1388_v39, 0.0  ;;  %2158 = vst.msk [vmem:[%s3045_s5 + $0x1b8] sm:$0xf] %vm2047_vm2, %v2547_v40  ;;  %2092 = vst.msk [vmem:[%s3045_s5 + $0xb0] sm:$0xf] %vm2047_vm2, %v2481_v41  ;;  %v1258_v53 = vmul.f32 %v3380_v7, %v2746_v49  ;;  %v1192_v54 = vmul.f32 %v3380_v7, %v818_v50  ;;  %v1077_v4 = vpop.f32.mrb[51].mxu1 }
 0x14c   : > { %v2548_v51 = vpack.c.bf16 %v1518_v42, %v1518_v42  ;;  %v2482_v52 = vpack.c.bf16 %v1452_v43, %v1452_v43  ;;  %2156 = vst.msk [vmem:[%s3045_s5 + $0x1b0] sm:$0xf] %vm2047_vm2, %v2545_v45  ;;  %v1329_v58 = vadd.f32 %v3372_v61, %v1194_v48  ;;  %v1256_v59 = vmul.f32 %v3380_v7, %v1074_v55 }
 0x14d   : > { %2095 = vst.msk [vmem:[%s3045_s5 + $0xbc] sm:$0xf] %vm2047_vm2, %v2484_v46  ;;  %v2546_v57 = vpack.c.bf16 %v1516_v47, %v1516_v47  ;;  %v1195_v60 = vmul.f32 %v3380_v7, %v2683_v56  ;;  %v1393_v2 = vadd.f32 %v3372_v61, %v1258_v53  ;;  %v1327_v0 = vadd.f32 %v3372_v61, %v1192_v54 }
 0x14e   : > { %2159 = vst.msk [vmem:[%s3045_s5 + $0x1bc] sm:$0xf] %vm2047_vm2, %v2548_v51  ;;  %2093 = vst.msk [vmem:[%s3045_s5 + $0xb4] sm:$0xf] %vm2047_vm2, %v2482_v52  ;;  %v1259_v1 = vmul.f32 %v3380_v7, %v2747_v62  ;;  %v1193_v3 = vmul.f32 %v3380_v7, %v821_v63  ;;  %v1457_v5 = vmax.f32 %v1329_v58, 0.0  ;;  %v1391_v6 = vadd.f32 %v3372_v61, %v1256_v59 }
 0x14f   : > { %2157 = vst.msk [vmem:[%s3045_s5 + $0x1b4] sm:$0xf] %vm2047_vm2, %v2546_v57  ;;  %v1330_v8 = vadd.f32 %v3372_v61, %v1195_v60  ;;  %v1257_v9 = vmul.f32 %v3380_v7, %v1077_v4  ;;  %v1521_v10 = vmax.f32 %v1393_v2, 0.0  ;;  %v1455_v11 = vmax.f32 %v1327_v0, 0.0  ;;  %v2686_v22 = vpop.f32.mrb[52].mxu0 }
 0x150   : > { %v1394_v12 = vadd.f32 %v3372_v61, %v1259_v1  ;;  %v1328_v13 = vadd.f32 %v3372_v61, %v1193_v3  ;;  %v2487_v14 = vpack.c.bf16 %v1457_v5, %v1457_v5  ;;  %v1519_v15 = vmax.f32 %v1391_v6, 0.0  ;;  %v2750_v27 = vpop.f32.mrb[52].mxu1  ;;  %v834_v28 = vpop.f32.mrb[53].mxu0 }
 0x151   : > { %v1458_v16 = vmax.f32 %v1330_v8, 0.0  ;;  %v1392_v17 = vadd.f32 %v3372_v61, %v1257_v9  ;;  %v2551_v18 = vpack.c.bf16 %v1521_v10, %v1521_v10  ;;  %v2485_v19 = vpack.c.bf16 %v1455_v11, %v1455_v11  ;;  %v1090_v33 = vpop.f32.mrb[53].mxu1  ;;  %v2687_v34 = vpop.f32.mrb[54].mxu0 }
 0x152   : > { %v1522_v20 = vmax.f32 %v1394_v12, 0.0  ;;  %v1456_v21 = vmax.f32 %v1328_v13, 0.0  ;;  %2098 = vst.msk [vmem:[%s3045_s5 + $0xc8] sm:$0xf] %vm2047_vm2, %v2487_v14  ;;  %v2549_v23 = vpack.c.bf16 %v1519_v15, %v1519_v15  ;;  %v1198_v26 = vmul.f32 %v3380_v7, %v2686_v22  ;;  %v2751_v39 = vpop.f32.mrb[54].mxu1  ;;  %v837_v40 = vpop.f32.mrb[55].mxu0 }
 0x153   : > { %v2488_v24 = vpack.c.bf16 %v1458_v16, %v1458_v16  ;;  %v1520_v25 = vmax.f32 %v1392_v17, 0.0  ;;  %2162 = vst.msk [vmem:[%s3045_s5 + $0x1c8] sm:$0xf] %vm2047_vm2, %v2551_v18  ;;  %2096 = vst.msk [vmem:[%s3045_s5 + $0xc0] sm:$0xf] %vm2047_vm2, %v2485_v19  ;;  %v1262_v31 = vmul.f32 %v3380_v7, %v2750_v27  ;;  %v1196_v32 = vmul.f32 %v3380_v7, %v834_v28  ;;  %v1093_v45 = vpop.f32.mrb[55].mxu1 }
 0x154   : > { %v2552_v29 = vpack.c.bf16 %v1522_v20, %v1522_v20  ;;  %v2486_v30 = vpack.c.bf16 %v1456_v21, %v1456_v21  ;;  %2160 = vst.msk [vmem:[%s3045_s5 + $0x1c0] sm:$0xf] %vm2047_vm2, %v2549_v23  ;;  %v1333_v36 = vadd.f32 %v3372_v61, %v1198_v26  ;;  %v1260_v37 = vmul.f32 %v3380_v7, %v1090_v33 }
 0x155   : > { %2099 = vst.msk [vmem:[%s3045_s5 + $0xcc] sm:$0xf] %vm2047_vm2, %v2488_v24  ;;  %v2550_v35 = vpack.c.bf16 %v1520_v25, %v1520_v25  ;;  %v1199_v38 = vmul.f32 %v3380_v7, %v2687_v34  ;;  %v1397_v41 = vadd.f32 %v3372_v61, %v1262_v31  ;;  %v1331_v42 = vadd.f32 %v3372_v61, %v1196_v32 }
 0x156   : > { %2163 = vst.msk [vmem:[%s3045_s5 + $0x1cc] sm:$0xf] %vm2047_vm2, %v2552_v29  ;;  %2097 = vst.msk [vmem:[%s3045_s5 + $0xc4] sm:$0xf] %vm2047_vm2, %v2486_v30  ;;  %v1263_v43 = vmul.f32 %v3380_v7, %v2751_v39  ;;  %v1197_v44 = vmul.f32 %v3380_v7, %v837_v40  ;;  %v1461_v46 = vmax.f32 %v1333_v36, 0.0  ;;  %v1395_v47 = vadd.f32 %v3372_v61, %v1260_v37 }
 0x157   : > { %2161 = vst.msk [vmem:[%s3045_s5 + $0x1c4] sm:$0xf] %vm2047_vm2, %v2550_v35  ;;  %v1334_v48 = vadd.f32 %v3372_v61, %v1199_v38  ;;  %v1261_v49 = vmul.f32 %v3380_v7, %v1093_v45  ;;  %v1525_v50 = vmax.f32 %v1397_v41, 0.0  ;;  %v1459_v51 = vmax.f32 %v1331_v42, 0.0  ;;  %v2690_v63 = vpop.f32.mrb[56].mxu0 }
 0x158   : > { %v1398_v52 = vadd.f32 %v3372_v61, %v1263_v43  ;;  %v1332_v53 = vadd.f32 %v3372_v61, %v1197_v44  ;;  %v2491_v54 = vpack.c.bf16 %v1461_v46, %v1461_v46  ;;  %v1523_v55 = vmax.f32 %v1395_v47, 0.0  ;;  %v2754_v4 = vpop.f32.mrb[56].mxu1  ;;  %v850_v5 = vpop.f32.mrb[57].mxu0 }
 0x159   : > { %v1462_v56 = vmax.f32 %v1334_v48, 0.0  ;;  %v1396_v57 = vadd.f32 %v3372_v61, %v1261_v49  ;;  %v2555_v58 = vpack.c.bf16 %v1525_v50, %v1525_v50  ;;  %v2489_v59 = vpack.c.bf16 %v1459_v51, %v1459_v51  ;;  %v1106_v11 = vpop.f32.mrb[57].mxu1  ;;  %v2691_v12 = vpop.f32.mrb[58].mxu0 }
 0x15a   : > { %v1526_v60 = vmax.f32 %v1398_v52, 0.0  ;;  %v1460_v62 = vmax.f32 %v1332_v53, 0.0  ;;  %2102 = vst.msk [vmem:[%s3045_s5 + $0xd8] sm:$0xf] %vm2047_vm2, %v2491_v54  ;;  %v2553_v2 = vpack.c.bf16 %v1523_v55, %v1523_v55  ;;  %v1202_v3 = vmul.f32 %v3380_v7, %v2690_v63  ;;  %v2755_v17 = vpop.f32.mrb[58].mxu1  ;;  %v853_v18 = vpop.f32.mrb[59].mxu0 }
 0x15b   : > { %v2492_v0 = vpack.c.bf16 %v1462_v56, %v1462_v56  ;;  %v1524_v1 = vmax.f32 %v1396_v57, 0.0  ;;  %2166 = vst.msk [vmem:[%s3045_s5 + $0x1d8] sm:$0xf] %vm2047_vm2, %v2555_v58  ;;  %2100 = vst.msk [vmem:[%s3045_s5 + $0xd0] sm:$0xf] %vm2047_vm2, %v2489_v59  ;;  %v1266_v9 = vmul.f32 %v3380_v7, %v2754_v4  ;;  %v1200_v10 = vmul.f32 %v3380_v7, %v850_v5  ;;  %v1109_v23 = vpop.f32.mrb[59].mxu1 }
 0x15c   : > { %v2556_v6 = vpack.c.bf16 %v1526_v60, %v1526_v60  ;;  %v2490_v8 = vpack.c.bf16 %v1460_v62, %v1460_v62  ;;  %2164 = vst.msk [vmem:[%s3045_s5 + $0x1d0] sm:$0xf] %vm2047_vm2, %v2553_v2  ;;  %v1337_v14 = vadd.f32 %v3372_v61, %v1202_v3  ;;  %v1264_v15 = vmul.f32 %v3380_v7, %v1106_v11 }
 0x15d   : > { %2103 = vst.msk [vmem:[%s3045_s5 + $0xdc] sm:$0xf] %vm2047_vm2, %v2492_v0  ;;  %v2554_v13 = vpack.c.bf16 %v1524_v1, %v1524_v1  ;;  %v1203_v16 = vmul.f32 %v3380_v7, %v2691_v12  ;;  %v1401_v19 = vadd.f32 %v3372_v61, %v1266_v9  ;;  %v1335_v20 = vadd.f32 %v3372_v61, %v1200_v10 }
 0x15e   : > { %2167 = vst.msk [vmem:[%s3045_s5 + $0x1dc] sm:$0xf] %vm2047_vm2, %v2556_v6  ;;  %2101 = vst.msk [vmem:[%s3045_s5 + $0xd4] sm:$0xf] %vm2047_vm2, %v2490_v8  ;;  %v1267_v21 = vmul.f32 %v3380_v7, %v2755_v17  ;;  %v1201_v22 = vmul.f32 %v3380_v7, %v853_v18  ;;  %v1465_v24 = vmax.f32 %v1337_v14, 0.0  ;;  %v1399_v25 = vadd.f32 %v3372_v61, %v1264_v15 }
 0x15f   : > { %2165 = vst.msk [vmem:[%s3045_s5 + $0x1d4] sm:$0xf] %vm2047_vm2, %v2554_v13  ;;  %v1338_v26 = vadd.f32 %v3372_v61, %v1203_v16  ;;  %v1265_v27 = vmul.f32 %v3380_v7, %v1109_v23  ;;  %v1529_v28 = vmax.f32 %v1401_v19, 0.0  ;;  %v1463_v29 = vmax.f32 %v1335_v20, 0.0  ;;  %v2694_v40 = vpop.f32.mrb[60].mxu0 }
 0x160   : > { %v1402_v30 = vadd.f32 %v3372_v61, %v1267_v21  ;;  %v1336_v31 = vadd.f32 %v3372_v61, %v1201_v22  ;;  %v2495_v32 = vpack.c.bf16 %v1465_v24, %v1465_v24  ;;  %v1527_v33 = vmax.f32 %v1399_v25, 0.0  ;;  %v2758_v45 = vpop.f32.mrb[60].mxu1  ;;  %v866_v46 = vpop.f32.mrb[61].mxu0 }
 0x161   : > { %v1466_v34 = vmax.f32 %v1338_v26, 0.0  ;;  %v1400_v35 = vadd.f32 %v3372_v61, %v1265_v27  ;;  %v2559_v36 = vpack.c.bf16 %v1529_v28, %v1529_v28  ;;  %v2493_v37 = vpack.c.bf16 %v1463_v29, %v1463_v29  ;;  %v1122_v51 = vpop.f32.mrb[61].mxu1  ;;  %v2695_v52 = vpop.f32.mrb[62].mxu0 }
 0x162   : > { %v1530_v38 = vmax.f32 %v1402_v30, 0.0  ;;  %v1464_v39 = vmax.f32 %v1336_v31, 0.0  ;;  %2106 = vst.msk [vmem:[%s3045_s5 + $0xe8] sm:$0xf] %vm2047_vm2, %v2495_v32  ;;  %v2557_v41 = vpack.c.bf16 %v1527_v33, %v1527_v33  ;;  %v1206_v44 = vmul.f32 %v3380_v7, %v2694_v40  ;;  %v2759_v57 = vpop.f32.mrb[62].mxu1  ;;  %v869_v58 = vpop.f32.mrb[63].mxu0 }
 0x163   : > { %v2496_v42 = vpack.c.bf16 %v1466_v34, %v1466_v34  ;;  %v1528_v43 = vmax.f32 %v1400_v35, 0.0  ;;  %2170 = vst.msk [vmem:[%s3045_s5 + $0x1e8] sm:$0xf] %vm2047_vm2, %v2559_v36  ;;  %2104 = vst.msk [vmem:[%s3045_s5 + $0xe0] sm:$0xf] %vm2047_vm2, %v2493_v37  ;;  %v1270_v49 = vmul.f32 %v3380_v7, %v2758_v45  ;;  %v1204_v50 = vmul.f32 %v3380_v7, %v866_v46  ;;  %v1125_v2 = vpop.f32.mrb[63].mxu1 }
 0x164   : > { %v2560_v47 = vpack.c.bf16 %v1530_v38, %v1530_v38  ;;  %v2494_v48 = vpack.c.bf16 %v1464_v39, %v1464_v39  ;;  %2168 = vst.msk [vmem:[%s3045_s5 + $0x1e0] sm:$0xf] %vm2047_vm2, %v2557_v41  ;;  %v1341_v54 = vadd.f32 %v3372_v61, %v1206_v44  ;;  %v1268_v55 = vmul.f32 %v3380_v7, %v1122_v51 }
 0x165   : > { %2107 = vst.msk [vmem:[%s3045_s5 + $0xec] sm:$0xf] %vm2047_vm2, %v2496_v42  ;;  %v2558_v53 = vpack.c.bf16 %v1528_v43, %v1528_v43  ;;  %v1207_v56 = vmul.f32 %v3380_v7, %v2695_v52  ;;  %v1405_v59 = vadd.f32 %v3372_v61, %v1270_v49  ;;  %v1339_v60 = vadd.f32 %v3372_v61, %v1204_v50 }
 0x166   : > { %2171 = vst.msk [vmem:[%s3045_s5 + $0x1ec] sm:$0xf] %vm2047_vm2, %v2560_v47  ;;  %2105 = vst.msk [vmem:[%s3045_s5 + $0xe4] sm:$0xf] %vm2047_vm2, %v2494_v48  ;;  %v1271_v62 = vmul.f32 %v3380_v7, %v2759_v57  ;;  %v1205_v63 = vmul.f32 %v3380_v7, %v869_v58  ;;  %v1469_v0 = vmax.f32 %v1341_v54, 0.0  ;;  %v1403_v1 = vadd.f32 %v3372_v61, %v1268_v55 }
 0x167   : > { %2169 = vst.msk [vmem:[%s3045_s5 + $0x1e4] sm:$0xf] %vm2047_vm2, %v2558_v53  ;;  %v1342_v3 = vadd.f32 %v3372_v61, %v1207_v56  ;;  %v1269_v4 = vmul.f32 %v3380_v7, %v1125_v2  ;;  %v1533_v5 = vmax.f32 %v1405_v59, 0.0  ;;  %v1467_v6 = vmax.f32 %v1339_v60, 0.0 }
 0x168   : > { %v1406_v8 = vadd.f32 %v3372_v61, %v1271_v62  ;;  %v1340_v9 = vadd.f32 %v3372_v61, %v1205_v63  ;;  %v2499_v10 = vpack.c.bf16 %v1469_v0, %v1469_v0  ;;  %v1531_v11 = vmax.f32 %v1403_v1, 0.0 }
 0x169   : > { %v1470_v12 = vmax.f32 %v1342_v3, 0.0  ;;  %v1404_v13 = vadd.f32 %v3372_v61, %v1269_v4  ;;  %v2563_v14 = vpack.c.bf16 %v1533_v5, %v1533_v5  ;;  %v2497_v15 = vpack.c.bf16 %v1467_v6, %v1467_v6 }
 0x16a   : > { %v1534_v7 = vmax.f32 %v1406_v8, 0.0  ;;  %v1468_v16 = vmax.f32 %v1340_v9, 0.0  ;;  %2110 = vst.msk [vmem:[%s3045_s5 + $0xf8] sm:$0xf] %vm2047_vm2, %v2499_v10  ;;  %v2561_v17 = vpack.c.bf16 %v1531_v11, %v1531_v11 }
 0x16b   : > { %v2500_v18 = vpack.c.bf16 %v1470_v12, %v1470_v12  ;;  %v1532_v19 = vmax.f32 %v1404_v13, 0.0  ;;  %2174 = vst.msk [vmem:[%s3045_s5 + $0x1f8] sm:$0xf] %vm2047_vm2, %v2563_v14  ;;  %2108 = vst.msk [vmem:[%s3045_s5 + $0xf0] sm:$0xf] %vm2047_vm2, %v2497_v15 }
 0x16c   : > { %v2564_v20 = vpack.c.bf16 %v1534_v7, %v1534_v7  ;;  %v2498_v21 = vpack.c.bf16 %v1468_v16, %v1468_v16  ;;  %2172 = vst.msk [vmem:[%s3045_s5 + $0x1f0] sm:$0xf] %vm2047_vm2, %v2561_v17 }
 0x16d   : > { %2111 = vst.msk [vmem:[%s3045_s5 + $0xfc] sm:$0xf] %vm2047_vm2, %v2500_v18  ;;  %v2562_v61 = vpack.c.bf16 %v1532_v19, %v1532_v19 }
 0x16e   : > { %2175 = vst.msk [vmem:[%s3045_s5 + $0x1fc] sm:$0xf] %vm2047_vm2, %v2564_v20  ;;  %2109 = vst.msk [vmem:[%s3045_s5 + $0xf4] sm:$0xf] %vm2047_vm2, %v2498_v21 }
 0x16f   : > { %2173 = vst.msk [vmem:[%s3045_s5 + $0x1f4] sm:$0xf] %vm2047_vm2, %v2562_v61 }
 0x170 PF: > { %s14_s15 = sadd.s32 1, %s2780_s15  }
 0x171   : > { %p11_p4 = scmp.ge.s32.totalorder %s14_s15, 4  }
 0x173   :  { %13 = sbr.rel (!%p11_p4) target bundleno = 1 (0x1), region = 66 }

</bundles_post_ra>
